<compile_context>
chip_gen: v7x
topology: tpu7x:2x2x1
jax: 0.10.0
libtpu: 0.0.40
codegen_flags: <defaults>
</compile_context>

<pallas_src>
import functools

import jax
import jax.numpy as jnp
from jax.experimental import pallas as pl
from jax.experimental.pallas import tpu as pltpu


def _round_up(x, mult):
    return (x + mult - 1) // mult * mult


def _device_vmem_budget():
    """(working-set budget, vmem_limit_bytes) per TPU generation."""
    try:
        kind = jax.devices()[0].device_kind.lower()
    except Exception:  # pragma: no cover - defensive
        kind = ""
    if "v7" in kind:
        # v7x: only 64 MiB VMEM per TensorCore -> keep 2-deep pipelining alive.
        return 40 * 1024 * 1024, 48 * 1024 * 1024
    # v5e / v6e: 128 MiB physical VMEM; raise the scoped limit well above the
    # 16/32 MiB defaults so the pipeline can use large tiles.
    return 64 * 1024 * 1024, 96 * 1024 * 1024


def _pick_rows_per_tile(oh, ow, wp, cin, cp, kh, kw, budget):
    """Largest output-row block whose double-buffered working set fits VMEM."""
    target_m = 2048 if budget > 48 * 1024 * 1024 else 1024  # rows per step
    th = max(1, min(oh, max(1, target_m // max(ow, 1))))

    def working_set(t):
        th_in = t + kh - 1
        x_tile = th_in * wp * cin * 2          # bf16 input tile
        y_tile = t * ow * cp * 2               # bf16 conv-output tile
        o_tile = t * ow * cp * 4               # f32 final-output tile (pass 2)
        stats = 2 * cp * 4
        w_res = kh * kw * cin * cp * 2         # resident weight (constant map)
        acc = t * ow * cp * 4                  # f32 accumulator
        ws1 = 2 * (x_tile + y_tile + stats) + w_res + acc
        ws2 = 2 * (y_tile + o_tile) + 2 * cp * 4
        return max(ws1, ws2)

    while th > 1 and working_set(th) > budget:
        th = max(1, th // 2)
    return th


def backbone_block_forward(x_nchw, conv_w, conv_b, bn_gamma, bn_beta,
                           *, stride, padding, eps=1e-5,
                           rows_per_tile=None, channels_last_output=False):
    """Fused Conv2d -> BatchNorm2d(train-mode batch stats) -> ReLU.

    x_nchw: (N, Cin, H, W).  conv_w: (Cout, Cin, kh, kw).
    conv_b is accepted for API parity with nn.Conv2d but is NOT used: the BN
    mean subtraction cancels a constant per-channel bias exactly.
    """
    del conv_b  # mathematically a no-op under train-mode BatchNorm

    if stride != 1:
        # TODO(synk): Hooknet's decoder only uses stride=1 Backbone_Blocks;
        # strided variants would need strided in-kernel tap slicing.
        raise NotImplementedError("fused kernel supports the stride=1 "
                                  "Backbone_Block used by Hooknet's decoder")

    n, cin, h, w = x_nchw.shape
    cout, _, kh, kw = conv_w.shape
    p = padding
    oh = h + 2 * p - kh + 1
    ow = w + 2 * p - kw + 1
    wp = w + 2 * p
    cp = _round_up(cout, 128)        # lane-dense output channels
    m = n * oh * ow                  # number of valid output pixels

    budget, vmem_limit = _device_vmem_budget()
    th = rows_per_tile if rows_per_tile is not None else \
        _pick_rows_per_tile(oh, ow, wp, cin, cp, kh, kw, budget)
    th = max(1, min(th, oh))
    tiles_per_img = pl.cdiv(oh, th)
    num_tiles = n * tiles_per_img    # prefer even so both v7x TCs stay busy
    tile_m = th * ow
    th_in = th + kh - 1              # input rows per tile (with conv halo)
    oh_pad = tiles_per_img * th      # output rows incl. padded tail rows

    # --- host glue: NHWC + spatial zero-pad + halo'd row-tile gather --------
    # Only the (kh-1)-row halo is duplicated per tile (no kh*kw im2col blowup).
    x_nhwc = jnp.transpose(x_nchw, (0, 2, 3, 1))
    xp = jnp.pad(x_nhwc, ((0, 0), (p, p + (oh_pad - oh)), (p, p), (0, 0)))
    x_tiles = jnp.stack(
        [xp[:, r * th:r * th + th_in] for r in range(tiles_per_img)], axis=1)
    x_tiles = x_tiles.reshape(num_tiles, th_in, wp, cin).astype(jnp.bfloat16)

    # Weight as (kh*kw, cin, cp) bf16, tap-major to match the in-kernel loop.
    w_taps = jnp.transpose(conv_w, (2, 3, 1, 0)).reshape(kh * kw, cin, cout)
    w_taps = jnp.pad(w_taps, ((0, 0), (0, 0), (0, cp - cout))
                     ).astype(jnp.bfloat16)

    # ------------------------------------------------------------------ pass 1
    # In-kernel im2col: accumulate kh*kw tap matmuls over the loaded tile,
    # store bf16 y, emit centred per-tile channel partials (sum, centred ssq)
    # masked for the zero-padded tail rows.
    def conv_stats_kernel(x_ref, w_ref, y_ref, sum_ref, css_ref):
        x = x_ref[0]                                   # (th_in, wp, cin) bf16
        acc = jnp.zeros((tile_m, cp), jnp.float32)
        for di in range(kh):
            for dj in range(kw):
                lhs = x[di:di + th, dj:dj + ow, :].reshape(tile_m, cin)
                acc += jnp.dot(lhs, w_ref[di * kw + dj],
                               preferred_element_type=jnp.float32)
        y_ref[0] = acc.astype(y_ref.dtype)             # bf16 y stream

        r = pl.program_id(0) % tiles_per_img
        valid_rows = jnp.minimum(oh - r * th, th)      # tail tile has fewer
        valid_m = (valid_rows * ow).astype(jnp.float32)
        row_ids = jax.lax.broadcasted_iota(jnp.int32, (tile_m, 1), 0)
        mask = row_ids < valid_rows * ow
        acc_m = jnp.where(mask, acc, 0.0)
        s = jnp.sum(acc_m, axis=0, keepdims=True)      # (1, cp)
        centred = jnp.where(mask, acc - s / valid_m, 0.0)
        sum_ref[0] = s
        css_ref[0] = jnp.sum(centred * centred, axis=0, keepdims=True)

    flops1 = 2 * num_tiles * tile_m * cin * cp * kh * kw
    bytes1 = (x_tiles.size * 2 + w_taps.size * 2
              + num_tiles * tile_m * cp * 2 + 2 * num_tiles * cp * 4)
    y_t, sums, css = pl.pallas_call(
        conv_stats_kernel,
        out_shape=(
            jax.ShapeDtypeStruct((num_tiles, tile_m, cp), jnp.bfloat16),
            jax.ShapeDtypeStruct((num_tiles, 1, cp), jnp.float32),
            jax.ShapeDtypeStruct((num_tiles, 1, cp), jnp.float32),
        ),
        grid_spec=pltpu.PrefetchScalarGridSpec(
            num_scalar_prefetch=0,
            grid=(num_tiles,),
            in_specs=[
                pl.BlockSpec((1, th_in, wp, cin), lambda i: (i, 0, 0, 0)),
                pl.BlockSpec((kh * kw, cin, cp), lambda i: (0, 0, 0)),  # resident
            ],
            out_specs=(
                pl.BlockSpec((1, tile_m, cp), lambda i: (i, 0, 0)),
                pl.BlockSpec((1, 1, cp), lambda i: (i, 0, 0)),
                pl.BlockSpec((1, 1, cp), lambda i: (i, 0, 0)),
            ),
        ),
        compiler_params=pltpu.CompilerParams(
            dimension_semantics=("parallel",),         # row tiles independent
            vmem_limit_bytes=vmem_limit,
        ),
        cost_estimate=pl.CostEstimate(
            flops=flops1, transcendentals=0, bytes_accessed=bytes1),
    )(x_tiles, w_taps)

    # --- tiny glue: Chan-style combine of per-tile partials, fold BN affine --
    sums2 = sums[:, 0, :]                              # (num_tiles, cp)
    css2 = css[:, 0, :]
    valid_rows_per_tile = jnp.minimum(oh - jnp.arange(tiles_per_img) * th, th)
    n_i = jnp.tile(valid_rows_per_tile * ow, n).astype(jnp.float32)
    mean = jnp.sum(sums2, axis=0) / m                  # (cp,)
    c_i = sums2 / n_i[:, None]
    var = (jnp.sum(css2, axis=0)
           + jnp.sum(n_i[:, None] * (c_i - mean[None, :]) ** 2, axis=0)) / m
    inv = jax.lax.rsqrt(var + jnp.float32(eps))
    gamma_p = jnp.pad(bn_gamma.astype(jnp.float32), (0, cp - cout))
    beta_p = jnp.pad(bn_beta.astype(jnp.float32), (0, cp - cout))
    a_aff = (gamma_p * inv).reshape(1, cp)
    b_aff = (beta_p - mean * gamma_p * inv).reshape(1, cp)

    # ------------------------------------------------------------------ pass 2
    # o = relu(y*a + b): pure lane-dense streaming, bf16 in / f32 out.
    def bn_relu_kernel(y_ref, a_ref, b_ref, o_ref):
        y = y_ref[0].astype(jnp.float32)
        o_ref[0] = jnp.maximum(y * a_ref[...] + b_ref[...],
                               jnp.float32(0.0)).astype(o_ref.dtype)

    flops2 = 3 * num_tiles * tile_m * cp
    bytes2 = num_tiles * tile_m * cp * (2 + 4) + 2 * cp * 4
    out_t = pl.pallas_call(
        bn_relu_kernel,
        out_shape=jax.ShapeDtypeStruct((num_tiles, tile_m, cp), jnp.float32),
        grid_spec=pltpu.PrefetchScalarGridSpec(
            num_scalar_prefetch=0,
            grid=(num_tiles,),
            in_specs=[
                pl.BlockSpec((1, tile_m, cp), lambda i: (i, 0, 0)),
                pl.BlockSpec((1, cp), lambda i: (0, 0)),
                pl.BlockSpec((1, cp), lambda i: (0, 0)),
            ],
            out_specs=pl.BlockSpec((1, tile_m, cp), lambda i: (i, 0, 0)),
        ),
        compiler_params=pltpu.CompilerParams(
            dimension_semantics=("parallel",),
            vmem_limit_bytes=vmem_limit,
        ),
        cost_estimate=pl.CostEstimate(
            flops=flops2, transcendentals=0, bytes_accessed=bytes2),
    )(y_t, a_aff, b_aff)

    # (num_tiles, tile_m, cp) -> (N, OHpad, OW, cp) -> drop padded rows/chans.
    out = out_t.reshape(n, oh_pad, ow, cp)[:, :oh, :, :cout]
    if channels_last_output:
        # Real Hooknet composition should stay channels-last end to end and
        # skip the NCHW repack entirely.
        return out
    return jnp.transpose(out, (0, 3, 1, 2))            # module contract: NCHW


def _reference(x_nchw, conv_w, conv_b, bn_gamma, bn_beta,
               *, stride, padding, eps=1e-5):
    # Same bf16 rounding of the conv operands as the kernel path, then a plain
    # f32 Conv -> train-mode BN -> ReLU exactly like the PyTorch module
    # (including the conv bias, which train-mode BN must cancel).
    x32 = x_nchw.astype(jnp.bfloat16).astype(jnp.float32)
    w32 = conv_w.astype(jnp.bfloat16).astype(jnp.float32)
    y = jax.lax.conv_general_dilated(
        x32, w32, window_strides=(stride, stride),
        padding=[(padding, padding), (padding, padding)],
        dimension_numbers=("NCHW", "OIHW", "NCHW"))
    y = y + conv_b.reshape(1, -1, 1, 1).astype(jnp.float32)
    mean = jnp.mean(y, axis=(0, 2, 3), keepdims=True)
    var = jnp.mean((y - mean) ** 2, axis=(0, 2, 3), keepdims=True)
    yhat = (y - mean) * jax.lax.rsqrt(var + eps)
    y = bn_gamma.reshape(1, -1, 1, 1) * yhat + bn_beta.reshape(1, -1, 1, 1)
    return jnp.maximum(y, 0.0)


if __name__ == "__main__":
    # Backbone_Block(in_c=4, out_c=8, k_size=3, stride=1, padding=1) at small
    # demo shapes (Hooknet uses the same block with 16..1280 channels).
    in_c, out_c, k_size, stride, padding = 4, 8, 3, 1, 1
    N, H, W = 2, 16, 16

    key = jax.random.PRNGKey(0)
    kx, kw_, kb = jax.random.split(key, 3)
    x = jax.random.normal(kx, (N, in_c, H, W), dtype=jnp.float32)
    conv_w = jax.random.normal(kw_, (out_c, in_c, k_size, k_size),
                               dtype=jnp.float32) * 0.1
    conv_b = jax.random.normal(kb, (out_c,), dtype=jnp.float32) * 0.1
    bn_gamma = jnp.ones((out_c,), dtype=jnp.float32)   # PyTorch default init
    bn_beta = jnp.zeros((out_c,), dtype=jnp.float32)   # PyTorch default init

    ref = _reference(x, conv_w, conv_b, bn_gamma, bn_beta,
                     stride=stride, padding=padding)

    # 1) auto tile sizing (one full-height row tile per image at this shape)
    fwd_auto = jax.jit(functools.partial(
        backbone_block_forward, stride=stride, padding=padding))
    out = jax.block_until_ready(fwd_auto(x, conv_w, conv_b, bn_gamma, bn_beta))
    assert out.shape == (N, out_c, H, W)
    # bf16 intermediate y stream -> slightly relaxed tolerance vs f32 ref.
    assert jnp.allclose(out, ref, atol=3e-2, rtol=3e-2), \
        float(jnp.max(jnp.abs(out - ref)))

    # 2) forced rows_per_tile=6 -> 3 row tiles per image with a 2-row padded
    #    tail, exercising the cdiv grid + masked tail-stats path.
    fwd_tail = jax.jit(functools.partial(
        backbone_block_forward, stride=stride, padding=padding,
        rows_per_tile=6))
    out2 = jax.block_until_ready(fwd_tail(x, conv_w, conv_b, bn_gamma, bn_beta))
    assert out2.shape == (N, out_c, H, W)
    assert jnp.allclose(out2, ref, atol=3e-2, rtol=3e-2), \
        float(jnp.max(jnp.abs(out2 - ref)))

    print("KERNEL_OK")
</pallas_src>

<mosaic_0001>
module attributes {stable_mosaic.version = 11 : i64} {
  func.func @conv_stats_kernel(%arg0: i32, %arg1: memref<1x18x18x4xbf16, #tpu.memory_space<vmem>>, %arg2: memref<9x4x128xbf16, #tpu.memory_space<vmem>>, %arg3: memref<1x256x128xbf16, #tpu.memory_space<vmem>>, %arg4: memref<1x1x128xf32, #tpu.memory_space<vmem>>, %arg5: memref<1x1x128xf32, #tpu.memory_space<vmem>>) attributes {dimension_semantics = [#tpu.dimension_semantics<parallel>], iteration_bounds = array<i64: 2>, scalar_prefetch = 0 : i64, scratch_operands = 0 : i64, tpu.core_type = #tpu.core_type<tc>, window_params = [{transform_indices = @transform_0, window_bounds = array<i64: 1, 18, 18, 4>}, {pipeline_mode = #tpu.pipeline_mode<synchronous>, transform_indices = @transform_1, window_bounds = array<i64: 9, 4, 128>}, {transform_indices = @transform_2, window_bounds = array<i64: 1, 256, 128>}, {transform_indices = @transform_3, window_bounds = array<i64: 1, 1, 128>}, {transform_indices = @transform_4, window_bounds = array<i64: 1, 1, 128>}]} {
    %c0 = arith.constant 0 : index
    %c0_0 = arith.constant 0 : index
    %c0_1 = arith.constant 0 : index
    %c0_2 = arith.constant 0 : index
    %0 = vector.load %arg1[%c0, %c0_0, %c0_1, %c0_2] : memref<1x18x18x4xbf16, #tpu.memory_space<vmem>>, vector<1x18x18x4xbf16>
    %1 = vector.shape_cast %0 : vector<1x18x18x4xbf16> to vector<18x18x4xbf16>
    %cst = arith.constant 0.000000e+00 : f32
    %2 = vector.broadcast %cst : f32 to vector<256x128xf32>
    %3 = vector.extract_strided_slice %1 {offsets = [0, 0, 0], sizes = [16, 16, 4], strides = [1, 1, 1]} : vector<18x18x4xbf16> to vector<16x16x4xbf16>
    %4 = vector.shape_cast %3 : vector<16x16x4xbf16> to vector<256x4xbf16>
    %c0_3 = arith.constant 0 : index
    %c0_4 = arith.constant 0 : index
    %c0_5 = arith.constant 0 : index
    %5 = vector.load %arg2[%c0_3, %c0_4, %c0_5] : memref<9x4x128xbf16, #tpu.memory_space<vmem>>, vector<1x4x128xbf16>
    %6 = vector.shape_cast %5 : vector<1x4x128xbf16> to vector<4x128xbf16>
    %cst_6 = arith.constant dense<0.000000e+00> : vector<256x128xf32>
    %7 = tpu.matmul %4, %6, %cst_6 {dimension_numbers = #tpu.dot_dimension_numbers<[1], [0], [0], [1], [0, 0, 1, 1], [], []>} : vector<256x4xbf16>, vector<4x128xbf16>, vector<256x128xf32> -> vector<256x128xf32>
    %8 = arith.addf %2, %7 : vector<256x128xf32>
    %9 = vector.extract_strided_slice %1 {offsets = [0, 1, 0], sizes = [16, 16, 4], strides = [1, 1, 1]} : vector<18x18x4xbf16> to vector<16x16x4xbf16>
    %10 = vector.shape_cast %9 : vector<16x16x4xbf16> to vector<256x4xbf16>
    %c1 = arith.constant 1 : index
    %c0_7 = arith.constant 0 : index
    %c0_8 = arith.constant 0 : index
    %11 = vector.load %arg2[%c1, %c0_7, %c0_8] : memref<9x4x128xbf16, #tpu.memory_space<vmem>>, vector<1x4x128xbf16>
    %12 = vector.shape_cast %11 : vector<1x4x128xbf16> to vector<4x128xbf16>
    %cst_9 = arith.constant dense<0.000000e+00> : vector<256x128xf32>
    %13 = tpu.matmul %10, %12, %cst_9 {dimension_numbers = #tpu.dot_dimension_numbers<[1], [0], [0], [1], [0, 0, 1, 1], [], []>} : vector<256x4xbf16>, vector<4x128xbf16>, vector<256x128xf32> -> vector<256x128xf32>
    %14 = arith.addf %8, %13 : vector<256x128xf32>
    %15 = vector.extract_strided_slice %1 {offsets = [0, 2, 0], sizes = [16, 16, 4], strides = [1, 1, 1]} : vector<18x18x4xbf16> to vector<16x16x4xbf16>
    %16 = vector.shape_cast %15 : vector<16x16x4xbf16> to vector<256x4xbf16>
    %c2 = arith.constant 2 : index
    %c0_10 = arith.constant 0 : index
    %c0_11 = arith.constant 0 : index
    %17 = vector.load %arg2[%c2, %c0_10, %c0_11] : memref<9x4x128xbf16, #tpu.memory_space<vmem>>, vector<1x4x128xbf16>
    %18 = vector.shape_cast %17 : vector<1x4x128xbf16> to vector<4x128xbf16>
    %cst_12 = arith.constant dense<0.000000e+00> : vector<256x128xf32>
    %19 = tpu.matmul %16, %18, %cst_12 {dimension_numbers = #tpu.dot_dimension_numbers<[1], [0], [0], [1], [0, 0, 1, 1], [], []>} : vector<256x4xbf16>, vector<4x128xbf16>, vector<256x128xf32> -> vector<256x128xf32>
    %20 = arith.addf %14, %19 : vector<256x128xf32>
    %21 = vector.extract_strided_slice %1 {offsets = [1, 0, 0], sizes = [16, 16, 4], strides = [1, 1, 1]} : vector<18x18x4xbf16> to vector<16x16x4xbf16>
    %22 = vector.shape_cast %21 : vector<16x16x4xbf16> to vector<256x4xbf16>
    %c3 = arith.constant 3 : index
    %c0_13 = arith.constant 0 : index
    %c0_14 = arith.constant 0 : index
    %23 = vector.load %arg2[%c3, %c0_13, %c0_14] : memref<9x4x128xbf16, #tpu.memory_space<vmem>>, vector<1x4x128xbf16>
    %24 = vector.shape_cast %23 : vector<1x4x128xbf16> to vector<4x128xbf16>
    %cst_15 = arith.constant dense<0.000000e+00> : vector<256x128xf32>
    %25 = tpu.matmul %22, %24, %cst_15 {dimension_numbers = #tpu.dot_dimension_numbers<[1], [0], [0], [1], [0, 0, 1, 1], [], []>} : vector<256x4xbf16>, vector<4x128xbf16>, vector<256x128xf32> -> vector<256x128xf32>
    %26 = arith.addf %20, %25 : vector<256x128xf32>
    %27 = vector.extract_strided_slice %1 {offsets = [1, 1, 0], sizes = [16, 16, 4], strides = [1, 1, 1]} : vector<18x18x4xbf16> to vector<16x16x4xbf16>
    %28 = vector.shape_cast %27 : vector<16x16x4xbf16> to vector<256x4xbf16>
    %c4 = arith.constant 4 : index
    %c0_16 = arith.constant 0 : index
    %c0_17 = arith.constant 0 : index
    %29 = vector.load %arg2[%c4, %c0_16, %c0_17] : memref<9x4x128xbf16, #tpu.memory_space<vmem>>, vector<1x4x128xbf16>
    %30 = vector.shape_cast %29 : vector<1x4x128xbf16> to vector<4x128xbf16>
    %cst_18 = arith.constant dense<0.000000e+00> : vector<256x128xf32>
    %31 = tpu.matmul %28, %30, %cst_18 {dimension_numbers = #tpu.dot_dimension_numbers<[1], [0], [0], [1], [0, 0, 1, 1], [], []>} : vector<256x4xbf16>, vector<4x128xbf16>, vector<256x128xf32> -> vector<256x128xf32>
    %32 = arith.addf %26, %31 : vector<256x128xf32>
    %33 = vector.extract_strided_slice %1 {offsets = [1, 2, 0], sizes = [16, 16, 4], strides = [1, 1, 1]} : vector<18x18x4xbf16> to vector<16x16x4xbf16>
    %34 = vector.shape_cast %33 : vector<16x16x4xbf16> to vector<256x4xbf16>
    %c5 = arith.constant 5 : index
    %c0_19 = arith.constant 0 : index
    %c0_20 = arith.constant 0 : index
    %35 = vector.load %arg2[%c5, %c0_19, %c0_20] : memref<9x4x128xbf16, #tpu.memory_space<vmem>>, vector<1x4x128xbf16>
    %36 = vector.shape_cast %35 : vector<1x4x128xbf16> to vector<4x128xbf16>
    %cst_21 = arith.constant dense<0.000000e+00> : vector<256x128xf32>
    %37 = tpu.matmul %34, %36, %cst_21 {dimension_numbers = #tpu.dot_dimension_numbers<[1], [0], [0], [1], [0, 0, 1, 1], [], []>} : vector<256x4xbf16>, vector<4x128xbf16>, vector<256x128xf32> -> vector<256x128xf32>
    %38 = arith.addf %32, %37 : vector<256x128xf32>
    %39 = vector.extract_strided_slice %1 {offsets = [2, 0, 0], sizes = [16, 16, 4], strides = [1, 1, 1]} : vector<18x18x4xbf16> to vector<16x16x4xbf16>
    %40 = vector.shape_cast %39 : vector<16x16x4xbf16> to vector<256x4xbf16>
    %c6 = arith.constant 6 : index
    %c0_22 = arith.constant 0 : index
    %c0_23 = arith.constant 0 : index
    %41 = vector.load %arg2[%c6, %c0_22, %c0_23] : memref<9x4x128xbf16, #tpu.memory_space<vmem>>, vector<1x4x128xbf16>
    %42 = vector.shape_cast %41 : vector<1x4x128xbf16> to vector<4x128xbf16>
    %cst_24 = arith.constant dense<0.000000e+00> : vector<256x128xf32>
    %43 = tpu.matmul %40, %42, %cst_24 {dimension_numbers = #tpu.dot_dimension_numbers<[1], [0], [0], [1], [0, 0, 1, 1], [], []>} : vector<256x4xbf16>, vector<4x128xbf16>, vector<256x128xf32> -> vector<256x128xf32>
    %44 = arith.addf %38, %43 : vector<256x128xf32>
    %45 = vector.extract_strided_slice %1 {offsets = [2, 1, 0], sizes = [16, 16, 4], strides = [1, 1, 1]} : vector<18x18x4xbf16> to vector<16x16x4xbf16>
    %46 = vector.shape_cast %45 : vector<16x16x4xbf16> to vector<256x4xbf16>
    %c7 = arith.constant 7 : index
    %c0_25 = arith.constant 0 : index
    %c0_26 = arith.constant 0 : index
    %47 = vector.load %arg2[%c7, %c0_25, %c0_26] : memref<9x4x128xbf16, #tpu.memory_space<vmem>>, vector<1x4x128xbf16>
    %48 = vector.shape_cast %47 : vector<1x4x128xbf16> to vector<4x128xbf16>
    %cst_27 = arith.constant dense<0.000000e+00> : vector<256x128xf32>
    %49 = tpu.matmul %46, %48, %cst_27 {dimension_numbers = #tpu.dot_dimension_numbers<[1], [0], [0], [1], [0, 0, 1, 1], [], []>} : vector<256x4xbf16>, vector<4x128xbf16>, vector<256x128xf32> -> vector<256x128xf32>
    %50 = arith.addf %44, %49 : vector<256x128xf32>
    %51 = vector.extract_strided_slice %1 {offsets = [2, 2, 0], sizes = [16, 16, 4], strides = [1, 1, 1]} : vector<18x18x4xbf16> to vector<16x16x4xbf16>
    %52 = vector.shape_cast %51 : vector<16x16x4xbf16> to vector<256x4xbf16>
    %c8 = arith.constant 8 : index
    %c0_28 = arith.constant 0 : index
    %c0_29 = arith.constant 0 : index
    %53 = vector.load %arg2[%c8, %c0_28, %c0_29] : memref<9x4x128xbf16, #tpu.memory_space<vmem>>, vector<1x4x128xbf16>
    %54 = vector.shape_cast %53 : vector<1x4x128xbf16> to vector<4x128xbf16>
    %cst_30 = arith.constant dense<0.000000e+00> : vector<256x128xf32>
    %55 = tpu.matmul %52, %54, %cst_30 {dimension_numbers = #tpu.dot_dimension_numbers<[1], [0], [0], [1], [0, 0, 1, 1], [], []>} : vector<256x4xbf16>, vector<4x128xbf16>, vector<256x128xf32> -> vector<256x128xf32>
    %56 = arith.addf %50, %55 : vector<256x128xf32>
    %57 = arith.truncf %56 : vector<256x128xf32> to vector<256x128xbf16>
    %c0_31 = arith.constant 0 : index
    %c0_32 = arith.constant 0 : index
    %c0_33 = arith.constant 0 : index
    %58 = vector.load %arg3[%c0_31, %c0_32, %c0_33] : memref<1x256x128xbf16, #tpu.memory_space<vmem>>, vector<1x256x128xbf16>
    %59 = vector.shape_cast %58 : vector<1x256x128xbf16> to vector<256x128xbf16>
    %60 = vector.shape_cast %57 : vector<256x128xbf16> to vector<1x256x128xbf16>
    tpu.vector_store %arg3[%c0_31, %c0_32, %c0_33], %60 {strides = array<i32>} : memref<1x256x128xbf16, #tpu.memory_space<vmem>>, vector<1x256x128xbf16>,
    %c1_i32 = arith.constant 1 : i32
    %c0_i32 = arith.constant 0 : i32
    %61 = arith.cmpi eq, %c1_i32, %c0_i32 : i32
    %c1_i32_34 = arith.constant 1 : i32
    %62 = arith.select %61, %c1_i32_34, %c1_i32 : i32
    %63 = arith.remsi %arg0, %62 : i32
    %c0_i32_35 = arith.constant 0 : i32
    %64 = arith.cmpi ne, %63, %c0_i32_35 : i32
    %c0_i32_36 = arith.constant 0 : i32
    %65 = arith.cmpi slt, %63, %c0_i32_36 : i32
    %c0_i32_37 = arith.constant 0 : i32
    %66 = arith.cmpi slt, %62, %c0_i32_37 : i32
    %67 = arith.xori %65, %66 : i1
    %68 = arith.andi %67, %64 : i1
    %69 = arith.addi %63, %62 : i32
    %70 = arith.select %68, %69, %63 : i32
    %c16_i32 = arith.constant 16 : i32
    %71 = arith.muli %70, %c16_i32 : i32
    %c16_i32_38 = arith.constant 16 : i32
    %72 = arith.subi %c16_i32_38, %71 : i32
    %c16_i32_39 = arith.constant 16 : i32
    %73 = arith.minsi %72, %c16_i32_39 : i32
    %c16_i32_40 = arith.constant 16 : i32
    %74 = arith.muli %73, %c16_i32_40 : i32
    %75 = arith.sitofp %74 : i32 to f32
    %76 = tpu.iota {dimensions = array<i32: 0>} : vector<256x1xi32>
    %c16_i32_41 = arith.constant 16 : i32
    %77 = arith.muli %73, %c16_i32_41 : i32
    %78 = vector.broadcast %77 : i32 to vector<256x1xi32>
    %79 = arith.cmpi slt, %76, %78 : vector<256x1xi32>
    %cst_42 = arith.constant 0.000000e+00 : f32
    %80 = vector.shape_cast %79 : vector<256x1xi1> to vector<256x1xi1>
    %81 = vector.broadcast %80 : vector<256x1xi1> to vector<256x128xi1>
    %82 = vector.broadcast %cst_42 : f32 to vector<256x128xf32>
    %83 = arith.select %81, %56, %82 : vector<256x128xi1>, vector<256x128xf32>
    %cst_43 = arith.constant dense<0.000000e+00> : vector<128xf32>
    %84 = vector.multi_reduction <add>, %83, %cst_43 [0] : vector<256x128xf32> to vector<128xf32>
    %85 = vector.shape_cast %84 : vector<128xf32> to vector<1x128xf32>
    %86 = vector.broadcast %75 : f32 to vector<1x128xf32>
    %87 = arith.divf %85, %86 : vector<1x128xf32>
    %88 = vector.broadcast %87 : vector<1x128xf32> to vector<256x128xf32>
    %89 = arith.subf %56, %88 : vector<256x128xf32>
    %cst_44 = arith.constant 0.000000e+00 : f32
    %90 = vector.shape_cast %79 : vector<256x1xi1> to vector<256x1xi1>
    %91 = vector.broadcast %90 : vector<256x1xi1> to vector<256x128xi1>
    %92 = vector.broadcast %cst_44 : f32 to vector<256x128xf32>
    %93 = arith.select %91, %89, %92 : vector<256x128xi1>, vector<256x128xf32>
    %c0_45 = arith.constant 0 : index
    %c0_46 = arith.constant 0 : index
    %c0_47 = arith.constant 0 : index
    %94 = vector.load %arg4[%c0_45, %c0_46, %c0_47] : memref<1x1x128xf32, #tpu.memory_space<vmem>>, vector<1x1x128xf32>
    %95 = vector.shape_cast %94 : vector<1x1x128xf32> to vector<1x128xf32>
    %96 = vector.shape_cast %85 : vector<1x128xf32> to vector<1x1x128xf32>
    tpu.vector_store %arg4[%c0_45, %c0_46, %c0_47], %96 {strides = array<i32>} : memref<1x1x128xf32, #tpu.memory_space<vmem>>, vector<1x1x128xf32>,
    %97 = arith.mulf %93, %93 : vector<256x128xf32>
    %cst_48 = arith.constant dense<0.000000e+00> : vector<128xf32>
    %98 = vector.multi_reduction <add>, %97, %cst_48 [0] : vector<256x128xf32> to vector<128xf32>
    %99 = vector.shape_cast %98 : vector<128xf32> to vector<1x128xf32>
    %c0_49 = arith.constant 0 : index
    %c0_50 = arith.constant 0 : index
    %c0_51 = arith.constant 0 : index
    %100 = vector.load %arg5[%c0_49, %c0_50, %c0_51] : memref<1x1x128xf32, #tpu.memory_space<vmem>>, vector<1x1x128xf32>
    %101 = vector.shape_cast %100 : vector<1x1x128xf32> to vector<1x128xf32>
    %102 = vector.shape_cast %99 : vector<1x128xf32> to vector<1x1x128xf32>
    tpu.vector_store %arg5[%c0_49, %c0_50, %c0_51], %102 {strides = array<i32>} : memref<1x1x128xf32, #tpu.memory_space<vmem>>, vector<1x1x128xf32>,
    return
  }
  func.func @transform_0(%arg0: i32) -> (i32, i32, i32, i32) {
    %c0_i32 = arith.constant 0 : i32
    %c0_i32_0 = arith.constant 0 : i32
    %c0_i32_1 = arith.constant 0 : i32
    %c0_i32_2 = arith.constant 0 : i32
    return %arg0, %c0_i32, %c0_i32_0, %c0_i32_1 : i32, i32, i32, i32
  }
  func.func @transform_1(%arg0: i32) -> (i32, i32, i32) {
    %c0_i32 = arith.constant 0 : i32
    %c0_i32_0 = arith.constant 0 : i32
    %c0_i32_1 = arith.constant 0 : i32
    %c0_i32_2 = arith.constant 0 : i32
    return %c0_i32, %c0_i32_0, %c0_i32_1 : i32, i32, i32
  }
  func.func @transform_2(%arg0: i32) -> (i32, i32, i32) {
    %c0_i32 = arith.constant 0 : i32
    %c0_i32_0 = arith.constant 0 : i32
    %c0_i32_1 = arith.constant 0 : i32
    return %arg0, %c0_i32, %c0_i32_0 : i32, i32, i32
  }
  func.func @transform_3(%arg0: i32) -> (i32, i32, i32) {
    %c0_i32 = arith.constant 0 : i32
    %c0_i32_0 = arith.constant 0 : i32
    %c0_i32_1 = arith.constant 0 : i32
    return %arg0, %c0_i32, %c0_i32_0 : i32, i32, i32
  }
  func.func @transform_4(%arg0: i32) -> (i32, i32, i32) {
    %c0_i32 = arith.constant 0 : i32
    %c0_i32_0 = arith.constant 0 : i32
    %c0_i32_1 = arith.constant 0 : i32
    return %arg0, %c0_i32, %c0_i32_0 : i32, i32, i32
  }
}

module attributes {stable_mosaic.version = 11 : i64} {
  func.func @bn_relu_kernel(%arg0: i32, %arg1: memref<1x256x128xbf16, #tpu.memory_space<vmem>>, %arg2: memref<1x128xf32, #tpu.memory_space<vmem>>, %arg3: memref<1x128xf32, #tpu.memory_space<vmem>>, %arg4: memref<1x256x128xf32, #tpu.memory_space<vmem>>) attributes {dimension_semantics = [#tpu.dimension_semantics<parallel>], iteration_bounds = array<i64: 2>, scalar_prefetch = 0 : i64, scratch_operands = 0 : i64, tpu.core_type = #tpu.core_type<tc>, window_params = [{transform_indices = @transform_0, window_bounds = array<i64: 1, 256, 128>}, {pipeline_mode = #tpu.pipeline_mode<synchronous>, transform_indices = @transform_1, window_bounds = array<i64: 1, 128>}, {pipeline_mode = #tpu.pipeline_mode<synchronous>, transform_indices = @transform_2, window_bounds = array<i64: 1, 128>}, {transform_indices = @transform_3, window_bounds = array<i64: 1, 256, 128>}]} {
    %c0 = arith.constant 0 : index
    %c0_0 = arith.constant 0 : index
    %c0_1 = arith.constant 0 : index
    %0 = vector.load %arg1[%c0, %c0_0, %c0_1] : memref<1x256x128xbf16, #tpu.memory_space<vmem>>, vector<1x256x128xbf16>
    %1 = vector.shape_cast %0 : vector<1x256x128xbf16> to vector<256x128xbf16>
    %2 = arith.extf %1 : vector<256x128xbf16> to vector<256x128xf32>
    %c0_2 = arith.constant 0 : index
    %c0_3 = arith.constant 0 : index
    %3 = vector.load %arg2[%c0_2, %c0_3] : memref<1x128xf32, #tpu.memory_space<vmem>>, vector<1x128xf32>
    %4 = vector.broadcast %3 : vector<1x128xf32> to vector<256x128xf32>
    %5 = arith.mulf %2, %4 : vector<256x128xf32>
    %c0_4 = arith.constant 0 : index
    %c0_5 = arith.constant 0 : index
    %6 = vector.load %arg3[%c0_4, %c0_5] : memref<1x128xf32, #tpu.memory_space<vmem>>, vector<1x128xf32>
    %7 = vector.broadcast %6 : vector<1x128xf32> to vector<256x128xf32>
    %8 = arith.addf %5, %7 : vector<256x128xf32>
    %cst = arith.constant 0.000000e+00 : f32
    %9 = vector.broadcast %cst : f32 to vector<256x128xf32>
    %10 = arith.maximumf %8, %9 : vector<256x128xf32>
    %c0_6 = arith.constant 0 : index
    %c0_7 = arith.constant 0 : index
    %c0_8 = arith.constant 0 : index
    %11 = vector.load %arg4[%c0_6, %c0_7, %c0_8] : memref<1x256x128xf32, #tpu.memory_space<vmem>>, vector<1x256x128xf32>
    %12 = vector.shape_cast %11 : vector<1x256x128xf32> to vector<256x128xf32>
    %13 = vector.shape_cast %10 : vector<256x128xf32> to vector<1x256x128xf32>
    tpu.vector_store %arg4[%c0_6, %c0_7, %c0_8], %13 {strides = array<i32>} : memref<1x256x128xf32, #tpu.memory_space<vmem>>, vector<1x256x128xf32>,
    return
  }
  func.func @transform_0(%arg0: i32) -> (i32, i32, i32) {
    %c0_i32 = arith.constant 0 : i32
    %c0_i32_0 = arith.constant 0 : i32
    %c0_i32_1 = arith.constant 0 : i32
    return %arg0, %c0_i32, %c0_i32_0 : i32, i32, i32
  }
  func.func @transform_1(%arg0: i32) -> (i32, i32) {
    %c0_i32 = arith.constant 0 : i32
    %c0_i32_0 = arith.constant 0 : i32
    %c0_i32_1 = arith.constant 0 : i32
    return %c0_i32, %c0_i32_0 : i32, i32
  }
  func.func @transform_2(%arg0: i32) -> (i32, i32) {
    %c0_i32 = arith.constant 0 : i32
    %c0_i32_0 = arith.constant 0 : i32
    %c0_i32_1 = arith.constant 0 : i32
    return %c0_i32, %c0_i32_0 : i32, i32
  }
  func.func @transform_3(%arg0: i32) -> (i32, i32, i32) {
    %c0_i32 = arith.constant 0 : i32
    %c0_i32_0 = arith.constant 0 : i32
    %c0_i32_1 = arith.constant 0 : i32
    return %arg0, %c0_i32, %c0_i32_0 : i32, i32, i32
  }
}

</mosaic_0001>

<bundles_post_ra>
// kernel: backbone_block_forward.3
= control target key start
LH: loop header
LB: loop body
LE: loop exit
PB: predicated region body
PF: predicated region fallthrough
CT: control target
= control target key end

     0   :  { %8 = vsyncpa [#allocation3], 0  ;;  %s1238_s0 = inlined_call_operand.hbm [shape: bf16[2,256,128], index: 0, kind: input, shape index: {}]   ;;  %s1239_s1 = inlined_call_operand.hbm [shape: f32[1,128], index: 1, kind: input, shape index: {}]   ;;  %s1240_s2 = inlined_call_operand.hbm [shape: f32[1,128], index: 2, kind: input, shape index: {}]   ;;  %s1241_s3 = inlined_call_operand.hbm [shape: f32[2,256,128], index: 3, kind: output, shape index: {}]  }
   0x1   :  { %10 = vsyncpa [#allocation3 + $0x1], 0 }
   0x2   :  { %11 = vsyncpa [#allocation6], 0 }
   0x3   :  { %12 = vsyncpa [#allocation4], 0 }
   0x4   :  { %14 = vsyncpa [#allocation4 + $0x1], 0  ;;  %s884_s12 = smov 0   ;;  %s886_s13 = smov 0  }
   0x5   :  { %s888_s14 = smov 0   ;;  %s890_s15 = smov 0  }
   0x6 LB: > { %s905_s16 = sadd.s32 4294967295, %s854_s15   ;;  %s526_s17 = sadd.s32 4294967294, %s854_s15   ;;  %s854_s15 = sphi %s890_s15, %s1266_s15   ;;  %s850_s14 = sphi %s888_s14, %s1265_s14   ;;  %s846_s13 = sphi %s886_s13, %s1264_s13   ;;  %s842_s12 = sphi %s884_s12, %s1263_s12  }
   0x7   : > { %s909_s18 = sadd.s32 1, %s854_s15   ;;  %s27_s19 = sadd.s32 1, %s850_s14 }
   0x8   : > { %s24_s20 = ssub.s32 %s854_s15, %s909_s18  ;;  %p34_p0 = scmp.ne.s32.totalorder %s850_s14, %s846_s13 }
   0x9   : > { %p25_p1 = scmp.eq.s32.totalorder %s24_s20, 0  ;;  %p35_p2 = scmp.eq.s32.totalorder %s854_s15, 0 }
   0xa   : > { %p40_p3 = scmp.ne.s32.totalorder %s846_s13, %s842_s12  ;;  %p1242_p4 = scmp.eq.s32.totalorder %s905_s16, 0 }
   0xb   : > { %s921_s21 = scalar_select %p25_p1, %s850_s14, %s27_s19  }
   0xc   : > { %p923_p5 = por %p35_p2, %p34_p0  ;;  %p929_p6 = por %p1242_p4, %p40_p3 }
   0xd   : > { %p106_p7 = scmp.eq.s32.totalorder %s905_s16, 1  ;;  %p112_p8 = scmp.eq.s32.totalorder %s526_s17, 1 }
   0xe   : > { %s1248_s23 = scalar_select %p929_p6, 1, 0 }
   0xf   : > { %p527_p9 = scmp.ge.s32.totalorder %s854_s15, 1  ;;  %p119_p10 = scmp.lt.s32.totalorder %s854_s15, 3 }
  0x10   : > { %p936_p11 = por %p106_p7, %p34_p0  ;;  %p940_p12 = por %p112_p8, %p40_p3 }
  0x11   : > { %p944_p13 = pnand %p527_p9, %p119_p10  ;;  %s856_s27 = smov [#allocation5]  }
  0x12   : > { %s1249_s24 = scalar_select %p936_p11, 1, 0 }
  0x13   : > { %s1250_s25 = scalar_select %p940_p12, 1, 0 }
  0x14   : > { %s1251_s26 = scalar_select %p944_p13, 1, 0 }
  0x15   : > { %p639_p2 = pneg %p944_p13  ;;  %s132_s28 = sshll.u32 %s856_s27, 4  ;;  %s133_s28 = int_to_ptr.vmem [resolvable:$true] %s132_s28 }
  0x16   : > { %p656_p4 = scmp.lt.s32.totalorder %s854_s15, 2  ;;  %p1252_p0 = scmp.eq.s32.totalorder %s905_s16, 0 }
  0x17   : > { %s857_s4 = smov [#allocation7]   ;;  %s698_s8 = scalar_lea.hbm %s1239_s1, 16 }
  0x18   : > { %p954_p7 = pnand %p639_p2, %p1252_p0  ;;  %p960_p3 = pnand %p656_p4, %p923_p5 }
  0x19   : > { %s143_s5 = sshll.u32 %s857_s4, 4  ;;  %p699_p8 = scmp.ne.s32.totalorder %s1239_s1, %s698_s8  ;;  %s964_s5 = int_to_ptr.vmem [resolvable:$true] %s143_s5 }
  0x1a   : > { %s1254_s30 = scalar_select %p960_p3, 1, 0 }
  0x1b   : > { %p700_p9 = pneg %p954_p7  ;;  %p705_p10 = scmp.lt.u32.totalorder %s698_s8, %s1239_s1 }
  0x1d   : > { %p701_p4 = pnand %p700_p9, %p699_p8 }
  0x1f   : > { %p702_p5 = pneg %p701_p4 }
  0x21   : > { %p707_p2 = pnand %p705_p10, %p702_p5 }
  0x23   : > { %710 = shalt.err (!%p707_p2)
}
  0x24   : > { %s711_s19 = scalar_lea.vmem %s133_s28, 16  ;;  %s718_s20 = scalar_lea.vmem %s133_s28, 32 }
  0x25   : > { %p712_p0 = scmp.ne.s32.totalorder %s133_s28, %s711_s19  ;;  %p719_p11 = scmp.lt.s32.totalorder %s133_s28, %s133_s28 }
  0x26   : > { %p720_p6 = scmp.lt.s32.totalorder %s718_s20, %s711_s19 }
  0x27   : > { %p714_p1 = pnand %p712_p0, %p700_p9 }
  0x28   : > { %p721_p13 = por %p720_p6, %p719_p11 }
  0x29   : > { %p715_p12 = pneg %p714_p1 }
  0x2b   : > { %p722_p3 = pnand %p721_p13, %p715_p12 }
  0x2d   : > { %725 = shalt.err (!%p722_p3)
}
  0x2e   : > { %642 = dma.hbm_to_vmem [thread:$0]  (!%p954_p7), %s1239_s1, 16, %s133_s28, [#allocation6]  }
  0x2f   : > { %s154_s4 = sand.u32 1, %s850_s14   ;;  %s726_s8 = scalar_lea.hbm %s1240_s2, 16 }
  0x30   : > { %p727_p1 = scmp.ne.s32.totalorder %s1240_s2, %s726_s8  ;;  %p733_p12 = scmp.lt.u32.totalorder %s726_s8, %s1240_s2 }
  0x32   : > { %p729_p6 = pnand %p727_p1, %p700_p9 }
  0x34   : > { %p730_p11 = pneg %p729_p6 }
  0x36   : > { %p735_p13 = pnand %p733_p12, %p730_p11 }
  0x38   : > { %738 = shalt.err (!%p735_p13)
}
  0x39   : > { %s739_s28 = scalar_lea.vmem %s964_s5, 16  ;;  %s746_s19 = scalar_lea.vmem %s964_s5, 32 }
  0x3a   : > { %p740_p3 = scmp.ne.s32.totalorder %s964_s5, %s739_s28  ;;  %p747_p5 = scmp.lt.s32.totalorder %s964_s5, %s964_s5 }
  0x3b   : > { %p748_p10 = scmp.lt.s32.totalorder %s746_s19, %s739_s28 }
  0x3c   : > { %p742_p8 = pnand %p740_p3, %p700_p9 }
  0x3d   : > { %p749_p2 = por %p748_p10, %p747_p5 }
  0x3e   : > { %p743_p4 = pneg %p742_p8 }
  0x40   : > { %p750_p0 = pnand %p749_p2, %p743_p4 }
  0x42   : > { %753 = shalt.err (!%p750_p0)
}
  0x43   : > { %645 = dma.hbm_to_vmem [thread:$0]  (!%p954_p7), %s1240_s2, 16, %s964_s5, [#allocation6]  }
  0x44   : > { %s531_s27 = sshll.u32 %s154_s4, 7  ;;  %s546_s6 = sshll.u32 %s854_s15, 11 }
  0x45   : > { %s1019_s9 = scalar_lea.hbm %s1238_s0, %s546_s6  ;;  %s158_s29 = scalar_lea.vmem [#allocation2], %s531_s27 }
  0x46   : > { %s165_s10 = sshll.u32 %s158_s29, 4  ;;  %s1023_s11 = scalar_lea.sflag [#allocation3], %s154_s4  ;;  %s1021_s10 = int_to_ptr.vmem [resolvable:$true] %s165_s10 }
  0x47   : > { %s754_s17 = scalar_lea.hbm %s1019_s9, 2048  ;;  %p1255_p7 = scmp.ne.s32.totalorder %s1254_s30, 0 }
  0x48   : > { %p755_p9 = scmp.ne.s32.totalorder %s1019_s9, %s754_s17  ;;  %s759_s19 = scalar_lea.hbm %s1238_s0, 4096 }
  0x49   : > { %p756_p1 = pneg %p1255_p7  ;;  %p760_p12 = scmp.lt.u32.totalorder %s1019_s9, %s1238_s0 }
  0x4a   : > { %p761_p13 = scmp.lt.u32.totalorder %s759_s19, %s754_s17  ;;  %p763_p8 = scmp.lt.u32.totalorder %s754_s17, %s1019_s9 }
  0x4b   : > { %p757_p6 = pnand %p756_p1, %p755_p9 }
  0x4c   : > { %p762_p3 = por %p761_p13, %p760_p12 }
  0x4d   : > { %p758_p11 = pneg %p757_p6 }
  0x4e   : > { %p764_p4 = por %p763_p8, %p762_p3 }
  0x50   : > { %p765_p5 = pnand %p764_p4, %p758_p11 }
  0x52   : > { %768 = shalt.err (!%p765_p5)
}
  0x53   : > { %s769_s4 = scalar_lea.vmem %s1021_s10, 2048  ;;  %s858_s27 = smov [#allocation2]  }
  0x54   : > { %p770_p10 = scmp.ne.s32.totalorder %s1021_s10, %s769_s4  ;;  %s774_s6 = sshll.u32 %s858_s27, 4  ;;  %s775_s6 = int_to_ptr.vmem [resolvable:$false] %s774_s6 }
  0x55   : > { %s776_s7 = scalar_lea.vmem %s775_s6, 4096  ;;  %p777_p9 = scmp.lt.s32.totalorder %s1021_s10, %s775_s6 }
  0x56   : > { %p772_p2 = pnand %p770_p10, %p756_p1  ;;  %p778_p6 = scmp.lt.s32.totalorder %s776_s7, %s769_s4 }
  0x58   : > { %p773_p0 = pneg %p772_p2  ;;  %p779_p12 = por %p778_p6, %p777_p9 }
  0x5a   : > { %p780_p13 = pnand %p779_p12, %p773_p0 }
  0x5c   : > { %783 = shalt.err (!%p780_p13)
}
  0x5d   : > { %s859_s8 = smov 64   ;;  %s860_s29 = smov 4  }
  0x5e   : > { %649 = dma.hbm_to_vmem [thread:$0]  (!%p1255_p7), %s1019_s9, 2048, %s1021_s10, %s1023_s11, %s859_s8, %s859_s8, %s860_s29  }
  0x5f   : > { %p1256_p1 = scmp.ne.s32.totalorder %s1251_s26, 0 }
  0x60   : > { %s1054_s17 = sand.u32 (!%p1256_p1), 1, %s846_s13   ;;  %p1257_p11 = scmp.ne.s32.totalorder (!%p1256_p1), %s1248_s23, 0 }
  0x61   : > { %177 = sbr.rel (%p1256_p1) target bundleno = 158 (0x9e), region = 32  ;;  %s535_s5 = sshll.u32 (!%p1256_p1), %s1054_s17, 7 }
  0x62   : > { %s180_s28 = scalar_lea.sflag (!%p1256_p1), [#allocation3], %s1054_s17  ;;  %s1058_s19 = scalar_lea.vmem (!%p1256_p1), [#allocation2], %s535_s5 }
  0x68   : > { %829 = dma.done.wait (%p1257_p11), %s180_s28, 2048  }
  0x69   : > { %831 = vsyncadd (%p1257_p11), %s180_s28, 4294965248  ;;  %p1258_p7 = scmp.eq.s32.totalorder %s905_s16, 0 }
  0x6b   : > { %833 = dma.done.wait (%p1258_p7), [#allocation6], 32   ;;  %p1259_p3 = pmov %p1258_p7 }
  0x6c   : > { %v549_v0 = vld [vmem:[%s1058_s19] sm:$0xff]   ;;  %v612_v4 = vld [vmem:[%s1058_s19 + $0x8] sm:$0xff]   ;;  %v613_v5 = vld [vmem:[%s1058_s19 + $0x10] sm:$0xff]   ;;  %s538_s23 = sshll.u32 %s1054_s17, 8  ;;  %s547_s30 = sshll.u32 %s905_s16, 12 }
  0x6d   : > { %835 = vsyncadd (%p1259_p3), [#allocation6], 4294967264  ;;  %v1069_v1 = vld [vmem:[#allocation5] ss:$0 sm:$0xff]  ;;  %v550_v2 = vunpack.c.l.bf16 %v549_v0  ;;  %v551_v3 = vunpack.c.h.bf16 %v549_v0  ;;  %v614_v6 = vld [vmem:[%s1058_s19 + $0x18] sm:$0xff]   ;;  %v554_v8 = vunpack.c.l.bf16 %v612_v4  ;;  %v555_v9 = vunpack.c.h.bf16 %v612_v4  ;;  %s1097_s26 = scalar_lea.vmem [#allocation8], %s538_s23  ;;  %s1184_s11 = scalar_lea.hbm %s1241_s3, %s547_s30 }
  0x6e   : > { %v1074_v7 = vld [vmem:[#allocation7] ss:$0 sm:$0xff]  ;;  %v558_v10 = vunpack.c.l.bf16 %v613_v5  ;;  %v559_v11 = vunpack.c.h.bf16 %v613_v5  ;;  %v562_v14 = vunpack.c.l.bf16 %v614_v6  ;;  %v563_v15 = vunpack.c.h.bf16 %v614_v6  ;;  %v616_v33 = vld [vmem:[%s1058_s19 + $0x28] sm:$0xff]   ;;  %v617_v34 = vld [vmem:[%s1058_s19 + $0x30] sm:$0xff]   ;;  %s434_s9 = sshll.u32 %s1097_s26, 4  ;;  %s421_s20 = scalar_lea.sflag [#allocation4], %s1054_s17  ;;  %s1186_s9 = int_to_ptr.vmem [resolvable:$true] %s434_s9 }
  0x6f   : > { %v285_v12 = vmul.f32 %v550_v2, %v1069_v1  ;;  %v286_v13 = vmul.f32 %v551_v3, %v1069_v1  ;;  %v287_v16 = vmul.f32 %v554_v8, %v1069_v1  ;;  %v288_v17 = vmul.f32 %v555_v9, %v1069_v1  ;;  %v615_v28 = vld [vmem:[%s1058_s19 + $0x20] sm:$0xff]   ;;  %v618_v39 = vld [vmem:[%s1058_s19 + $0x38] sm:$0xff]   ;;  %v620_v6 = vld [vmem:[%s1058_s19 + $0x48] sm:$0xff]   ;;  %s784_s22 = scalar_lea.vmem %s1186_s9, 4096  ;;  %p1260_p4 = scmp.ne.s32.totalorder %s1249_s24, 0 }
  0x70   : > { %v289_v18 = vmul.f32 %v558_v10, %v1069_v1  ;;  %v290_v19 = vmul.f32 %v559_v11, %v1069_v1  ;;  %v291_v22 = vmul.f32 %v562_v14, %v1069_v1  ;;  %v292_v23 = vmul.f32 %v563_v15, %v1069_v1  ;;  %v619_v0 = vld [vmem:[%s1058_s19 + $0x40] sm:$0xff]   ;;  %v621_v8 = vld [vmem:[%s1058_s19 + $0x50] sm:$0xff]   ;;  %p785_p8 = scmp.ne.s32.totalorder %s1186_s9, %s784_s22  ;;  %s861_s4 = smov [#allocation8]  }
  0x71   : > { %v324_v20 = vadd.f32 %v1074_v7, %v285_v12  ;;  %v325_v21 = vadd.f32 %v1074_v7, %v286_v13  ;;  %v326_v24 = vadd.f32 %v1074_v7, %v287_v16  ;;  %v327_v25 = vadd.f32 %v1074_v7, %v288_v17  ;;  %v622_v13 = vld [vmem:[%s1058_s19 + $0x58] sm:$0xff]   ;;  %s788_s27 = sshll.u32 %s861_s4, 4  ;;  %s789_s27 = int_to_ptr.vmem [resolvable:$false] %s788_s27 }
  0x72   : > { %v328_v26 = vadd.f32 %v1074_v7, %v289_v18  ;;  %v329_v27 = vadd.f32 %v1074_v7, %v290_v19  ;;  %v330_v31 = vadd.f32 %v1074_v7, %v291_v22  ;;  %v331_v32 = vadd.f32 %v1074_v7, %v292_v23  ;;  %p786_p5 = pnand %p785_p8, %p1260_p4  ;;  %s790_s6 = scalar_lea.vmem %s789_s27, 8192 }
  0x73   : > { %v356_v29 = vmax.f32 %v324_v20, 0.0  ;;  %v357_v30 = vmax.f32 %v325_v21, 0.0  ;;  %v358_v35 = vmax.f32 %v326_v24, 0.0  ;;  %v359_v36 = vmax.f32 %v327_v25, 0.0  ;;  %p791_p2 = scmp.lt.s32.totalorder %s1186_s9, %s789_s27  ;;  %p792_p0 = scmp.lt.s32.totalorder %s790_s6, %s784_s22 }
  0x74   : > { %v360_v37 = vmax.f32 %v328_v26, 0.0  ;;  %v361_v38 = vmax.f32 %v329_v27, 0.0  ;;  %v362_v40 = vmax.f32 %v330_v31, 0.0  ;;  %v363_v41 = vmax.f32 %v331_v32, 0.0  ;;  %p787_p10 = pneg %p786_p5 }
  0x75   : > { %388 = vst [vmem:[%s1097_s26] sm:$0xff] %v356_v29  ;;  %389 = vst [vmem:[%s1097_s26 + $0x8] sm:$0xff] %v357_v30  ;;  %v566_v42 = vunpack.c.l.bf16 %v615_v28  ;;  %v567_v43 = vunpack.c.h.bf16 %v615_v28  ;;  %v570_v44 = vunpack.c.l.bf16 %v616_v33  ;;  %v571_v45 = vunpack.c.h.bf16 %v616_v33  ;;  %p793_p9 = por %p792_p0, %p791_p2 }
  0x76   : > { %390 = vst [vmem:[%s1097_s26 + $0x10] sm:$0xff] %v358_v35  ;;  %391 = vst [vmem:[%s1097_s26 + $0x18] sm:$0xff] %v359_v36  ;;  %v574_v46 = vunpack.c.l.bf16 %v617_v34  ;;  %v575_v47 = vunpack.c.h.bf16 %v617_v34  ;;  %v578_v50 = vunpack.c.l.bf16 %v618_v39  ;;  %v579_v51 = vunpack.c.h.bf16 %v618_v39 }
  0x77   : > { %392 = vst [vmem:[%s1097_s26 + $0x20] sm:$0xff] %v360_v37  ;;  %393 = vst [vmem:[%s1097_s26 + $0x28] sm:$0xff] %v361_v38  ;;  %v293_v48 = vmul.f32 %v566_v42, %v1069_v1  ;;  %v294_v49 = vmul.f32 %v567_v43, %v1069_v1  ;;  %v295_v52 = vmul.f32 %v570_v44, %v1069_v1  ;;  %v582_v16 = vunpack.c.l.bf16 %v619_v0  ;;  %v623_v38 = vld [vmem:[%s1058_s19 + $0x60] sm:$0xff]   ;;  %v624_v43 = vld [vmem:[%s1058_s19 + $0x68] sm:$0xff]   ;;  %p794_p6 = pnand %p793_p9, %p787_p10 }
  0x78   : > { %394 = vst [vmem:[%s1097_s26 + $0x30] sm:$0xff] %v362_v40  ;;  %395 = vst [vmem:[%s1097_s26 + $0x38] sm:$0xff] %v363_v41  ;;  %v296_v53 = vmul.f32 %v571_v45, %v1069_v1  ;;  %v297_v54 = vmul.f32 %v574_v46, %v1069_v1  ;;  %v298_v55 = vmul.f32 %v575_v47, %v1069_v1  ;;  %v583_v17 = vunpack.c.h.bf16 %v619_v0  ;;  %v625_v44 = vld [vmem:[%s1058_s19 + $0x70] sm:$0xff]  }
  0x79   : > { %v332_v56 = vadd.f32 %v1074_v7, %v293_v48  ;;  %v333_v57 = vadd.f32 %v1074_v7, %v294_v49  ;;  %v299_v58 = vmul.f32 %v578_v50, %v1069_v1  ;;  %v300_v59 = vmul.f32 %v579_v51, %v1069_v1  ;;  %v626_v49 = vld [vmem:[%s1058_s19 + $0x78] sm:$0xff]  }
  0x7a   : > { %v334_v60 = vadd.f32 %v1074_v7, %v295_v52  ;;  %v335_v61 = vadd.f32 %v1074_v7, %v296_v53  ;;  %v336_v62 = vadd.f32 %v1074_v7, %v297_v54  ;;  %v337_v63 = vadd.f32 %v1074_v7, %v298_v55 }
  0x7b   : > { %v364_v2 = vmax.f32 %v332_v56, 0.0  ;;  %v365_v3 = vmax.f32 %v333_v57, 0.0  ;;  %v338_v4 = vadd.f32 %v1074_v7, %v299_v58  ;;  %v339_v5 = vadd.f32 %v1074_v7, %v300_v59 }
  0x7c   : > { %v366_v9 = vmax.f32 %v334_v60, 0.0  ;;  %v367_v10 = vmax.f32 %v335_v61, 0.0  ;;  %v368_v11 = vmax.f32 %v336_v62, 0.0  ;;  %v369_v12 = vmax.f32 %v337_v63, 0.0 }
  0x7d   : > { %396 = vst [vmem:[%s1097_s26 + $0x40] sm:$0xff] %v364_v2  ;;  %397 = vst [vmem:[%s1097_s26 + $0x48] sm:$0xff] %v365_v3  ;;  %v370_v14 = vmax.f32 %v338_v4, 0.0  ;;  %v371_v15 = vmax.f32 %v339_v5, 0.0  ;;  %v586_v18 = vunpack.c.l.bf16 %v620_v6  ;;  %v587_v19 = vunpack.c.h.bf16 %v620_v6 }
  0x7e   : > { %398 = vst [vmem:[%s1097_s26 + $0x50] sm:$0xff] %v366_v9  ;;  %399 = vst [vmem:[%s1097_s26 + $0x58] sm:$0xff] %v367_v10  ;;  %v590_v20 = vunpack.c.l.bf16 %v621_v8  ;;  %v591_v21 = vunpack.c.h.bf16 %v621_v8  ;;  %v301_v22 = vmul.f32 %v582_v16, %v1069_v1  ;;  %v302_v23 = vmul.f32 %v583_v17, %v1069_v1 }
  0x7f   : > { %400 = vst [vmem:[%s1097_s26 + $0x60] sm:$0xff] %v368_v11  ;;  %401 = vst [vmem:[%s1097_s26 + $0x68] sm:$0xff] %v369_v12  ;;  %v594_v24 = vunpack.c.l.bf16 %v622_v13  ;;  %v595_v25 = vunpack.c.h.bf16 %v622_v13  ;;  %v303_v26 = vmul.f32 %v586_v18, %v1069_v1  ;;  %v304_v27 = vmul.f32 %v587_v19, %v1069_v1 }
  0x80   : > { %402 = vst [vmem:[%s1097_s26 + $0x70] sm:$0xff] %v370_v14  ;;  %403 = vst [vmem:[%s1097_s26 + $0x78] sm:$0xff] %v371_v15  ;;  %v305_v28 = vmul.f32 %v590_v20, %v1069_v1  ;;  %v306_v29 = vmul.f32 %v591_v21, %v1069_v1  ;;  %v340_v30 = vadd.f32 %v1074_v7, %v301_v22  ;;  %v598_v52 = vunpack.c.l.bf16 %v623_v38 }
  0x81   : > { %v341_v31 = vadd.f32 %v1074_v7, %v302_v23  ;;  %v307_v32 = vmul.f32 %v594_v24, %v1069_v1  ;;  %v308_v33 = vmul.f32 %v595_v25, %v1069_v1  ;;  %v342_v34 = vadd.f32 %v1074_v7, %v303_v26 }
  0x82   : > { %v343_v35 = vadd.f32 %v1074_v7, %v304_v27  ;;  %v344_v36 = vadd.f32 %v1074_v7, %v305_v28  ;;  %v345_v37 = vadd.f32 %v1074_v7, %v306_v29  ;;  %v372_v39 = vmax.f32 %v340_v30, 0.0 }
  0x83   : > { %v373_v40 = vmax.f32 %v341_v31, 0.0  ;;  %v346_v41 = vadd.f32 %v1074_v7, %v307_v32  ;;  %v347_v42 = vadd.f32 %v1074_v7, %v308_v33  ;;  %v374_v45 = vmax.f32 %v342_v34, 0.0 }
  0x84   : > { %v375_v46 = vmax.f32 %v343_v35, 0.0  ;;  %v376_v47 = vmax.f32 %v344_v36, 0.0  ;;  %v377_v48 = vmax.f32 %v345_v37, 0.0  ;;  %404 = vst [vmem:[%s1097_s26 + $0x80] sm:$0xff] %v372_v39  ;;  %v599_v53 = vunpack.c.h.bf16 %v623_v38 }
  0x85   : > { %405 = vst [vmem:[%s1097_s26 + $0x88] sm:$0xff] %v373_v40  ;;  %v378_v50 = vmax.f32 %v346_v41, 0.0  ;;  %v379_v51 = vmax.f32 %v347_v42, 0.0  ;;  %406 = vst [vmem:[%s1097_s26 + $0x90] sm:$0xff] %v374_v45  ;;  %v602_v54 = vunpack.c.l.bf16 %v624_v43  ;;  %v603_v55 = vunpack.c.h.bf16 %v624_v43 }
  0x86   : > { %407 = vst [vmem:[%s1097_s26 + $0x98] sm:$0xff] %v375_v46  ;;  %408 = vst [vmem:[%s1097_s26 + $0xa0] sm:$0xff] %v376_v47  ;;  %v606_v56 = vunpack.c.l.bf16 %v625_v44  ;;  %v607_v57 = vunpack.c.h.bf16 %v625_v44  ;;  %v309_v58 = vmul.f32 %v598_v52, %v1069_v1  ;;  %v310_v59 = vmul.f32 %v599_v53, %v1069_v1 }
  0x87   : > { %409 = vst [vmem:[%s1097_s26 + $0xa8] sm:$0xff] %v377_v48  ;;  %410 = vst [vmem:[%s1097_s26 + $0xb0] sm:$0xff] %v378_v50  ;;  %v610_v60 = vunpack.c.l.bf16 %v626_v49  ;;  %v611_v61 = vunpack.c.h.bf16 %v626_v49  ;;  %v311_v62 = vmul.f32 %v602_v54, %v1069_v1  ;;  %v312_v63 = vmul.f32 %v603_v55, %v1069_v1 }
  0x88   : > { %411 = vst [vmem:[%s1097_s26 + $0xb8] sm:$0xff] %v379_v51  ;;  %v313_v0 = vmul.f32 %v606_v56, %v1069_v1  ;;  %v314_v2 = vmul.f32 %v607_v57, %v1069_v1  ;;  %v348_v3 = vadd.f32 %v1074_v7, %v309_v58  ;;  %v349_v4 = vadd.f32 %v1074_v7, %v310_v59 }
  0x89   : > { %v315_v5 = vmul.f32 %v610_v60, %v1069_v1  ;;  %v316_v6 = vmul.f32 %v611_v61, %v1069_v1  ;;  %v350_v8 = vadd.f32 %v1074_v7, %v311_v62  ;;  %v351_v9 = vadd.f32 %v1074_v7, %v312_v63 }
  0x8a   : > { %v352_v10 = vadd.f32 %v1074_v7, %v313_v0  ;;  %v353_v11 = vadd.f32 %v1074_v7, %v314_v2  ;;  %v380_v12 = vmax.f32 %v348_v3, 0.0  ;;  %v381_v13 = vmax.f32 %v349_v4, 0.0 }
  0x8b   : > { %v354_v1 = vadd.f32 %v1074_v7, %v315_v5  ;;  %v355_v14 = vadd.f32 %v1074_v7, %v316_v6  ;;  %v382_v15 = vmax.f32 %v350_v8, 0.0  ;;  %v383_v16 = vmax.f32 %v351_v9, 0.0 }
  0x8c   : > { %v384_v17 = vmax.f32 %v352_v10, 0.0  ;;  %v385_v18 = vmax.f32 %v353_v11, 0.0  ;;  %412 = vst [vmem:[%s1097_s26 + $0xc0] sm:$0xff] %v380_v12  ;;  %413 = vst [vmem:[%s1097_s26 + $0xc8] sm:$0xff] %v381_v13 }
  0x8d   : > { %v386_v19 = vmax.f32 %v354_v1, 0.0  ;;  %v387_v7 = vmax.f32 %v355_v14, 0.0  ;;  %414 = vst [vmem:[%s1097_s26 + $0xd0] sm:$0xff] %v382_v15  ;;  %415 = vst [vmem:[%s1097_s26 + $0xd8] sm:$0xff] %v383_v16 }
  0x8e   : > { %416 = vst [vmem:[%s1097_s26 + $0xe0] sm:$0xff] %v384_v17  ;;  %417 = vst [vmem:[%s1097_s26 + $0xe8] sm:$0xff] %v385_v18 }
  0x8f   : > { %418 = vst [vmem:[%s1097_s26 + $0xf0] sm:$0xff] %v386_v19  ;;  %419 = vst [vmem:[%s1097_s26 + $0xf8] sm:$0xff] %v387_v7 }
  0x90   : > { %797 = shalt.err (!%p794_p6)
}
  0x91   : > { %s798_s7 = scalar_lea.hbm %s1184_s11, 4096  ;;  %s802_s5 = scalar_lea.hbm %s1241_s3, 8192 }
  0x92   : > { %p799_p12 = scmp.ne.s32.totalorder %s1184_s11, %s798_s7  ;;  %p803_p11 = scmp.lt.u32.totalorder %s1184_s11, %s1241_s3 }
  0x93   : > { %p804_p7 = scmp.lt.u32.totalorder %s802_s5, %s798_s7  ;;  %p806_p8 = scmp.lt.u32.totalorder %s798_s7, %s1184_s11 }
  0x94   : > { %p800_p13 = pnand %p799_p12, %p1260_p4 }
  0x95   : > { %p805_p3 = por %p804_p7, %p803_p11 }
  0x96   : > { %p801_p1 = pneg %p800_p13 }
  0x97   : > { %p807_p5 = por %p806_p8, %p805_p3 }
  0x99   : > { %p808_p10 = pnand %p807_p5, %p801_p1 }
  0x9b   : > { %811 = shalt.err (!%p808_p10)
}
  0x9c   : > { %s862_s23 = smov 128   ;;  %s863_s26 = smov 8  }
  0x9d   : > { %637 = dma.vmem_to_hbm [thread:$0]  (%p1260_p4), %s1186_s9, 4096, %s1184_s11, %s421_s20, %s862_s23, %s862_s23, %s863_s26  }
  0x9e PF: > { %s449_s30 = sand.u32 1, %s842_s12   ;;  %p1261_p2 = scmp.ne.s32.totalorder %s1250_s25, 0 }
  0x9f   : > { %p1262_p0 = scmp.ge.s32.totalorder %s854_s15, 2  ;;  %s450_s16 = scalar_lea.sflag [#allocation4], %s449_s30 }
  0xa1   : > { %p651_p9 = pnand %p1262_p0, %p1261_p2 }
  0xa3   : > { %837 = dma.done.wait (!%p651_p9), %s450_s16, 4096  }
  0xa4   : > { %839 = vsyncadd (!%p651_p9), %s450_s16, 4294963200  ;;  %p17_p6 = scmp.ge.s32.totalorder %s909_s18, 4   ;;  %s1263_s12 = smov %s846_s13 }
  0xa5   : > { %s1264_s13 = smov %s850_s14  ;;  %s1265_s14 = smov %s921_s21 }
  0xa6   : > { %s1266_s15 = smov %s909_s18  ;;  %19 = sbr.rel (!%p17_p6) target bundleno = 6 (0x6), region = 85 }
  0xad   :  { %455 = vsyncpa [#allocation3], 1 }
  0xae   :  { %457 = vsyncpa [#allocation3 + $0x1], 1 }
  0xaf   :  { %458 = vsyncpa [#allocation6], 1 }
  0xb0   :  { %459 = vsyncpa [#allocation4], 1 }
  0xb1   :  { %461 = vsyncpa [#allocation4 + $0x1], 1 }

// kernel: backbone_block_forward.2
= control target key start
LH: loop header
LB: loop body
LE: loop exit
PB: predicated region body
PF: predicated region fallthrough
CT: control target
= control target key end

     0   :  { %10 = vsyncpa [#allocation3], 0  ;;  %s6507_s0 = inlined_call_operand.hbm [shape: bf16[2,18,18,4], index: 0, kind: input, shape index: {}]   ;;  %s6508_s1 = inlined_call_operand.hbm [shape: bf16[9,4,128], index: 1, kind: input, shape index: {}]   ;;  %s6509_s2 = inlined_call_operand.hbm [shape: bf16[2,256,128], index: 2, kind: output, shape index: {0}]   ;;  %s6510_s3 = inlined_call_operand.hbm [shape: f32[2,1,128], index: 3, kind: output, shape index: {1}]   ;;  %s6511_s4 = inlined_call_operand.hbm [shape: f32[2,1,128], index: 4, kind: output, shape index: {2}]  }
   0x1   :  { %12 = vsyncpa [#allocation3 + $0x1], 0 }
   0x2   :  { %13 = vsyncpa [#allocation6], 0 }
   0x3   :  { %14 = vsyncpa [#allocation4], 0 }
   0x4   :  { %16 = vsyncpa [#allocation4 + $0x1], 0 }
   0x5   :  { %17 = vsyncpa [#allocation9], 0 }
   0x6   :  { %19 = vsyncpa [#allocation9 + $0x1], 0  ;;  %s5084_s15 = smov 0   ;;  %s5086_s16 = smov 0  }
   0x7   :  { %s5088_s17 = smov 0   ;;  %s5090_s18 = smov 0  }
   0x8 LB: > { %s5105_s19 = sadd.s32 4294967295, %s5046_s18   ;;  %s3642_s20 = sadd.s32 4294967294, %s5046_s18   ;;  %s5046_s18 = sphi %s5090_s18, %s6605_s18   ;;  %s5042_s17 = sphi %s5088_s17, %s6604_s17   ;;  %s5038_s16 = sphi %s5086_s16, %s6603_s16   ;;  %s5034_s15 = sphi %s5084_s15, %s6602_s15  }
   0x9   : > { %p45_p0 = scmp.ne.s32.totalorder %s5038_s16, %s5034_s15  ;;  %p6512_p1 = scmp.eq.s32.totalorder %s5105_s19, 0 }
   0xa   : > { %p96_p3 = scmp.eq.s32.totalorder %s3642_s20, 1  ;;  %p3643_p5 = scmp.ge.s32.totalorder %s5046_s18, 1 }
   0xb   : > { %p5116_p4 = por %p6512_p1, %p45_p0  ;;  %p155_p7 = scmp.lt.s32.totalorder %s5046_s18, 3 }
   0xc   : > { %p5121_p6 = por %p96_p3, %p45_p0  ;;  %s5048_s24 = smov [#allocation5]  }
   0xd   : > { %s6545_s21 = scalar_select %p5116_p4, 1, 0 }
   0xe   : > { %s6546_s22 = scalar_select %p5121_p6, 1, 0 }
   0xf   : > { %p5126_p8 = pnand %p3643_p5, %p155_p7  ;;  %s167_s25 = sshll.u32 %s5048_s24, 4  ;;  %s5130_s25 = int_to_ptr.vmem [resolvable:$true] %s167_s25 }
  0x10   : > { %s5142_s27 = sadd.s32 1, %s5046_s18   ;;  %s32_s28 = sadd.s32 1, %s5042_s17 }
  0x11   : > { %s6547_s23 = scalar_select %p5126_p8, 1, 0 }
  0x12   : > { %p4775_p9 = pneg %p5126_p8  ;;  %s29_s29 = ssub.s32 %s5046_s18, %s5142_s27 }
  0x13   : > { %s4858_s6 = scalar_lea.hbm %s6508_s1, 288 }
  0x14   : > { %p5137_p11 = pnand %p4775_p9, %p6512_p1  ;;  %p4859_p12 = scmp.ne.s32.totalorder %s6508_s1, %s4858_s6 }
  0x15   : > { %p4865_p5 = scmp.lt.u32.totalorder %s4858_s6, %s6508_s1 }
  0x16   : > { %p4860_p13 = pneg %p5137_p11 }
  0x18   : > { %p4861_p0 = pnand %p4860_p13, %p4859_p12 }
  0x1a   : > { %p4862_p3 = pneg %p4861_p0 }
  0x1c   : > { %p4867_p7 = pnand %p4865_p5, %p4862_p3 }
  0x1e   : > { %4870 = shalt.err (!%p4867_p7)
}
  0x1f   : > { %s4871_s11 = scalar_lea.vmem %s5130_s25, 288  ;;  %p4879_p2 = scmp.lt.s32.totalorder %s5130_s25, %s5130_s25 }
  0x20   : > { %p4872_p9 = scmp.ne.s32.totalorder %s5130_s25, %s4871_s11  ;;  %p4880_p6 = scmp.lt.s32.totalorder %s4871_s11, %s4871_s11 }
  0x22   : > { %p4874_p10 = pnand %p4872_p9, %p4860_p13  ;;  %p4881_p4 = por %p4880_p6, %p4879_p2 }
  0x24   : > { %p4875_p1 = pneg %p4874_p10 }
  0x26   : > { %p4882_p8 = pnand %p4881_p4, %p4875_p1 }
  0x28   : > { %4885 = shalt.err (!%p4882_p8)
}
  0x29   : > { %s5049_s12 = smov 32   ;;  %s5050_s13 = smov 2  }
  0x2a   : > { %4778 = dma.hbm_to_vmem [thread:$0]  (!%p5137_p11), %s6508_s1, 288, %s5130_s25, [#allocation6], %s5049_s12, %s5049_s12, %s5050_s13  }
  0x2b   : > { %p30_p2 = scmp.eq.s32.totalorder %s29_s29, 0  ;;  %p39_p1 = scmp.ne.s32.totalorder %s5042_s17, %s5038_s16 }
  0x2c   : > { %p40_p4 = scmp.eq.s32.totalorder %s5046_s18, 0  ;;  %p4794_p6 = scmp.lt.s32.totalorder %s5046_s18, 2 }
  0x2d   : > { %s5173_s30 = scalar_select %p30_p2, %s5042_s17, %s32_s28  }
  0x2e   : > { %p41_p8 = por %p40_p4, %p39_p1  ;;  %p6549_p10 = scmp.eq.s32.totalorder %s5105_s19, 1 }
  0x2f   : > { %s181_s6 = sand.u32 1, %s5042_s17   ;;  %s4761_s7 = smul.u32 3456, %s5046_s18 }
  0x30   : > { %p5177_p12 = por %p6549_p10, %p39_p1  ;;  %s4760_s8 = smul.u32 216, %s181_s6 }
  0x31   : > { %s5186_s10 = scalar_lea.hbm %s6507_s0, %s4761_s7  ;;  %p5188_p11 = pnand %p4794_p6, %p41_p8 }
  0x32   : > { %s185_s28 = scalar_lea.vmem [#allocation2], %s4760_s8  ;;  %s5194_s11 = scalar_lea.sflag [#allocation3], %s181_s6 }
  0x33   : > { %s192_s29 = sshll.u32 %s185_s28, 4  ;;  %s4886_s12 = scalar_lea.hbm %s5186_s10, 3456  ;;  %s5192_s29 = int_to_ptr.vmem [resolvable:$true] %s192_s29 }
  0x34   : > { %p4887_p13 = scmp.ne.s32.totalorder %s5186_s10, %s4886_s12  ;;  %p4888_p0 = pneg %p5188_p11 }
  0x35   : > { %s4891_s24 = scalar_lea.hbm %s6507_s0, 6912  ;;  %p4892_p7 = scmp.lt.u32.totalorder %s5186_s10, %s6507_s0 }
  0x36   : > { %p4889_p3 = pnand %p4888_p0, %p4887_p13  ;;  %p4893_p9 = scmp.lt.u32.totalorder %s4891_s24, %s4886_s12 }
  0x37   : > { %p4895_p1 = scmp.lt.u32.totalorder %s4886_s12, %s5186_s10 }
  0x38   : > { %p4890_p5 = pneg %p4889_p3  ;;  %p4894_p2 = por %p4893_p9, %p4892_p7 }
  0x3a   : > { %p4896_p4 = por %p4895_p1, %p4894_p2 }
  0x3c   : > { %p4897_p6 = pnand %p4896_p4, %p4890_p5 }
  0x3e   : > { %4900 = shalt.err (!%p4897_p6)
}
  0x3f   : > { %s4901_s6 = scalar_lea.vmem %s5192_s29, 3456  ;;  %s5051_s8 = smov [#allocation2]  }
  0x40   : > { %p4902_p8 = scmp.ne.s32.totalorder %s5192_s29, %s4901_s6  ;;  %s4906_s9 = sshll.u32 %s5051_s8, 4  ;;  %s4907_s9 = int_to_ptr.vmem [resolvable:$false] %s4906_s9 }
  0x41   : > { %s4908_s28 = scalar_lea.vmem %s4907_s9, 6912  ;;  %p4909_p3 = scmp.lt.s32.totalorder %s5192_s29, %s4907_s9 }
  0x42   : > { %p4904_p10 = pnand %p4902_p8, %p4888_p0  ;;  %p4910_p7 = scmp.lt.s32.totalorder %s4908_s28, %s4901_s6 }
  0x44   : > { %p4905_p13 = pneg %p4904_p10  ;;  %p4911_p9 = por %p4910_p7, %p4909_p3 }
  0x46   : > { %p4912_p2 = pnand %p4911_p9, %p4905_p13 }
  0x48   : > { %4915 = shalt.err (!%p4912_p2)
}
  0x49   : > { %s5052_s12 = smov 64   ;;  %s5053_s13 = smov 4  }
  0x4a   : > { %4782 = dma.hbm_to_vmem [thread:$0]  (!%p5188_p11), %s5186_s10, 3456, %s5192_s29, %s5194_s11, %s5052_s12, %s5052_s12, %s5053_s13  }
  0x4b   : > { %p6552_p0 = scmp.ne.s32.totalorder %s6547_s23, 0 }
  0x4d   : > { %204 = sbr.rel (%p6552_p0) target bundleno = 764 (0x2fc), region = 28 }
  0x54   : > { %s5225_s14 = sand.u32 1, %s5038_s16   ;;  %p6553_p5 = scmp.ne.s32.totalorder %s6545_s21, 0 }
  0x55   : > { %s4762_s24 = smul.u32 216, %s5225_s14  ;;  %s207_s7 = scalar_lea.sflag [#allocation3], %s5225_s14 }
  0x57   : > { %s5229_s26 = scalar_lea.vmem [#allocation2], %s4762_s24 }
  0x58   : > { %5017 = dma.done.wait (%p6553_p5), %s207_s7, 3456  }
  0x59   : > { %5019 = vsyncadd (%p6553_p5), %s207_s7, 4294963840  ;;  %p6554_p11 = scmp.eq.s32.totalorder %s5105_s19, 0 }
  0x5b   : > { %5021 = dma.done.wait (%p6554_p11), [#allocation6], 288   ;;  %p6555_p1 = pmov %p6554_p11 }
  0x5c   : > { %vm789_vm0 = vcmask 1041408   ;;  %vm303_vm1 = vsmask.f32 3328  ;;  %vm304_vm2 = vsmask.f32 7440  ;;  %vm740_vm3 = vcmask 31744  }
  0x5d   : > { %5023 = vsyncadd (%p6555_p1), [#allocation6], 4294967008  ;;  %v691_v0 = vld [vmem:[#allocation5 + $0x2] sm:$0x3]  ;;  %v1902_v1 = vld [vmem:[#allocation5 + $0x8] sm:$0x3] }
  0x5e   : > { %v5240_v2 = vld [vmem:[%s5229_s26] sm:$0xf]  ;;  %4750 = vmatprep.subr.msk.bf16.mxu1 %vm789_vm0, %v691_v0  ;;  %4754 = vmatprep.subr.msk.bf16.mxu0 %vm789_vm0, %v1902_v1  ;;  %v791_v3 = vsel %vm789_vm0, %v691_v0, 0  ;;  %v5246_v4 = vsel %vm789_vm0, %v1902_v1, 0  ;;  %v5249_v5 = vld [vmem:[%s5229_s26 + $0x4] sm:$0xf]  ;;  %vm5278_vm4 = vmor %vm303_vm1, %vm304_vm2 }
  0x5f   : > { %6556 = vst [vmem:[#allocation15_spill] sm:$0xff] %v5246_v4  ;;  %v250_v6 = vld [vmem:[%s5229_s26 + $0x8] sm:$0x1]  ;;  %4187 = vmatpush3.bf16.msra.mxu1 %v791_v3  ;;  %4323 = vmatpush3.bf16.msra.mxu0 %v5246_v4  ;;  %v307_v7 = vshrl.u32 %v5240_v2, 16  ;;  %v310_v8 = vshll.u32 %v5240_v2, 16  ;;  %v316_v9 = vshll.u32 %v5249_v5, 16 }
  0x60   : > { %v320_v10 = vshrl.u32 %v5249_v5, 16  ;;  %v302_v11 = vld [vmem:[#allocation5] sm:$0x3]  ;;  %v326_v12 = vshll.u32 %v250_v6, 16  ;;  %v5259_v13 = vld [vmem:[%s5229_s26 + $0xc] sm:$0xf] }
  0x61   : > { %4751 = vmatprep.subr.msk.bf16.mxu1 %vm789_vm0, %v302_v11  ;;  %v5262_v14 = vld [vmem:[%s5229_s26 + $0x10] sm:$0xf]  ;;  %v309_v15 = vrot.slane %v307_v7, 4  ;;  %v312_v16 = vrot.slane %v310_v8, 5  ;;  %v318_v17 = vrot.slane %v316_v9, 5  ;;  %v331_v21 = vshrl.u32 %v5259_v13, 16 }
  0x62   : > { %v322_v18 = vrot.slane %v320_v10, 4  ;;  %v5265_v19 = vld [vmem:[%s5229_s26 + $0x14] sm:$0x1]  ;;  %v328_v20 = vrot.slane %v326_v12, 5  ;;  %v334_v22 = vshll.u32 %v5259_v13, 16  ;;  %v340_v23 = vshll.u32 %v5262_v14, 16 }
  0x63   : > { %v2114_v24 = vld [vmem:[#allocation5 + $0xa] sm:$0x3]  ;;  %v313_v25 = vor.u32 %v312_v16, %v309_v15  ;;  %v344_v27 = vshrl.u32 %v5262_v14, 16  ;;  %v350_v28 = vshll.u32 %v5265_v19, 16  ;;  %v333_v31 = vrot.slane %v331_v21, 4  ;;  %s3649_s21 = sshll.u32 %s5225_s14, 7 }
  0x64   : > { %v323_v26 = vor.u32 %v322_v18, %v318_v17  ;;  %4756 = vmatprep.subr.msk.bf16.mxu0 %vm789_vm0, %v2114_v24  ;;  %v5274_v29 = vld [vmem:[%s5229_s26 + $0x18] sm:$0xf]  ;;  %v336_v32 = vrot.slane %v334_v22, 5  ;;  %v342_v33 = vrot.slane %v340_v23, 5  ;;  %v5284_v34 = vcombine.low %v5259_v13, %v5262_v14  ;;  %v5287_v39 = vld [vmem:[%s5229_s26 + $0x1c] sm:$0xf] }
  0x65   : > { %v314_v35 = vrot.slane %v313_v25, 4  ;;  %v346_v37 = vrot.slane %v344_v27, 4  ;;  %v352_v38 = vrot.slane %v350_v28, 5  ;;  %v1277_v41 = vrot.slane %v5265_v19, 5  ;;  %v5292_v43 = vld [vmem:[%s5229_s26 + $0x20] sm:$0x1] }
  0x66   : > { %v324_v36 = vrot.slane %v323_v26, 4  ;;  %v337_v40 = vor.u32 %v336_v32, %v333_v31  ;;  %v1083_v42 = vsel %vm789_vm0, %v302_v11, 0  ;;  %v355_v44 = vshrl.u32 %v5274_v29, 16  ;;  %v5304_v57 = vld [vmem:[%s5229_s26 + $0x24] sm:$0xf]  ;;  %s6162_s23 = scalar_lea.vmem [#allocation7], %s3649_s21 }
  0x67   : > { %v319_v45 = vsel %vm5278_vm4, %v314_v35, %v318_v17  ;;  %v347_v47 = vor.u32 %v346_v37, %v342_v33  ;;  %v358_v48 = vshll.u32 %v5274_v29, 16  ;;  %v364_v52 = vshll.u32 %v5287_v39, 16  ;;  %v5312_v62 = vld [vmem:[%s5229_s26 + $0x28] sm:$0xf]  ;;  %v5317_v6 = vld [vmem:[%s5229_s26 + $0x2c] sm:$0x1] }
  0x68   : > { %v329_v46 = vsel %vm5278_vm4, %v324_v36, %v328_v20  ;;  %v338_v50 = vrot.slane %v337_v40, 4  ;;  %v357_v51 = vrot.slane %v355_v44, 4  ;;  %v368_v55 = vshrl.u32 %v5287_v39, 16  ;;  %v5320_v7 = vld [vmem:[%s5229_s26 + $0x30] sm:$0xf]  ;;  %s3937_s10 = sshll.u32 %s5105_s19, 11 }
  0x69   : > { %v3650_v49 = vcombine.low %v319_v45, %v329_v46  ;;  %v348_v53 = vrot.slane %v347_v47, 4  ;;  %v360_v54 = vrot.slane %v358_v48, 5  ;;  %v374_v56 = vshll.u32 %v5292_v43, 16  ;;  %v5331_v22 = vld [vmem:[%s5229_s26 + $0x34] sm:$0xf]  ;;  %s3480_s25 = sshll.u32 %s6162_s23, 4  ;;  %s6292_s6 = scalar_lea.hbm %s6509_s2, %s3937_s10  ;;  %s6294_s25 = int_to_ptr.vmem [resolvable:$true] %s3480_s25 }
  0x6a   : > { %v343_v58 = vsel %vm5278_vm4, %v338_v50, %v342_v33  ;;  %v366_v59 = vrot.slane %v364_v52, 5  ;;  %v1281_v60 = vrot.slane %v5287_v39, 5  ;;  %v1284_v61 = vrot.slane %v5292_v43, 5  ;;  %v5337_v28 = vld [vmem:[%s5229_s26 + $0x38] sm:$0x1]  ;;  %s3459_s8 = scalar_lea.sflag [#allocation4], %s5225_s14 }
  0x6b   : > { %4188 = vmatprep.mubr.msk.bf16.mxu1 %vm740_vm3, %v3650_v49  ;;  %v353_v63 = vsel %vm5278_vm4, %v348_v53, %v352_v38  ;;  %v361_v0 = vor.u32 %v360_v54, %v357_v51  ;;  %v370_v1 = vrot.slane %v368_v55, 4  ;;  %v376_v3 = vrot.slane %v374_v56, 5  ;;  %v5341_v36 = vld [vmem:[%s5229_s26 + $0x3c] sm:$0xf]  ;;  %v5351_v48 = vld [vmem:[%s5229_s26 + $0x40] sm:$0xf] }
  0x6c   : > { %v3651_v8 = vcombine.low %v343_v58, %v353_v63  ;;  %v2122_v9 = vsel %vm789_vm0, %v2114_v24, 0  ;;  %v379_v10 = vshrl.u32 %v5304_v57, 16  ;;  %v382_v11 = vshll.u32 %v5304_v57, 16  ;;  %v5354_v52 = vld [vmem:[%s5229_s26 + $0x44] sm:$0x1]  ;;  %s4916_s9 = scalar_lea.vmem %s6294_s25, 2048 }
  0x6d   : > { %v362_v12 = vrot.slane %v361_v0, 4  ;;  %v371_v15 = vor.u32 %v370_v1, %v366_v59  ;;  %v388_v16 = vshll.u32 %v5312_v62, 16  ;;  %v392_v17 = vshrl.u32 %v5312_v62, 16  ;;  %v5367_v63 = vld [vmem:[#allocation5 + $0xc] sm:$0x3]  ;;  %p4917_p4 = scmp.ne.s32.totalorder %s6294_s25, %s4916_s9  ;;  %s5054_s28 = smov [#allocation7]  }
  0x6e   : > { %4324 = vmatprep.mubr.msk.bf16.mxu0 %vm740_vm3, %v3651_v8  ;;  %4189 = vmatmul.mubr.msk.bf16.vlgmr.msra.gmra.mrb[0].mxu1 %vm740_vm3, %v3651_v8  ;;  %v381_v18 = vrot.slane %v379_v10, 4  ;;  %v384_v20 = vrot.slane %v382_v11, 5  ;;  %v398_v21 = vshll.u32 %v5317_v6, 16  ;;  %v403_v23 = vshrl.u32 %v5320_v7, 16  ;;  %s4920_s12 = sshll.u32 %s5054_s28, 4  ;;  %s4921_s12 = int_to_ptr.vmem [resolvable:$false] %s4920_s12 }
  0x6f   : > { %4221 = vmatpush3.bf16.msra.mxu1 %v1083_v42  ;;  %v367_v24 = vsel %vm5278_vm4, %v362_v12, %v366_v59  ;;  %v372_v25 = vrot.slane %v371_v15, 4  ;;  %v390_v26 = vrot.slane %v388_v16, 5  ;;  %v394_v27 = vrot.slane %v392_v17, 4  ;;  %v5365_v59 = vld [vmem:[%s5229_s26 + $0x48] sm:$0xf]  ;;  %p4918_p6 = pnand %p4917_p4, %p5177_p12  ;;  %s4922_s13 = scalar_lea.vmem %s4921_s12, 4096 }
  0x70   : > { %v385_v31 = vor.u32 %v384_v20, %v381_v18  ;;  %v400_v32 = vrot.slane %v398_v21, 5  ;;  %v405_v33 = vrot.slane %v403_v23, 4  ;;  %v406_v35 = vshll.u32 %v5320_v7, 16  ;;  %v5376_v16 = vld [vmem:[%s5229_s26 + $0x4c] sm:$0xf]  ;;  %p4923_p10 = scmp.lt.s32.totalorder %s6294_s25, %s4921_s12  ;;  %p4924_p13 = scmp.lt.s32.totalorder %s4922_s13, %s4916_s9 }
  0x71   : > { %v377_v37 = vsel %vm5278_vm4, %v372_v25, %v376_v3  ;;  %v395_v38 = vor.u32 %v394_v27, %v390_v26  ;;  %v412_v40 = vshll.u32 %v5331_v22, 16  ;;  %v416_v42 = vshrl.u32 %v5331_v22, 16  ;;  %v5389_v25 = vld [vmem:[%s5229_s26 + $0x50] sm:$0x1]  ;;  %v5393_v27 = vld [vmem:[%s5229_s26 + $0x54] sm:$0xf]  ;;  %p4919_p8 = pneg %p4918_p6 }
  0x72   : > { %v5347_v44 = vcombine.low %v367_v24, %v377_v37  ;;  %v386_v45 = vrot.slane %v385_v31, 4  ;;  %v408_v46 = vrot.slane %v406_v35, 5  ;;  %v422_v47 = vshll.u32 %v5337_v28, 16  ;;  %p4925_p3 = por %p4924_p13, %p4923_p10 }
  0x73   : > { %v396_v49 = vrot.slane %v395_v38, 4  ;;  %v414_v50 = vrot.slane %v412_v40, 5  ;;  %v418_v51 = vrot.slane %v416_v42, 4  ;;  %v427_v53 = vshrl.u32 %v5341_v36, 16 }
  0x74   : > { %6559 = vst [vmem:[#allocation16_spill] sm:$0xff] %v5347_v44  ;;  %4325 = vmatmul.mubr.msk.bf16.vlgmr.msra.gmra.mrb[0].mxu0 %vm740_vm3, %v5347_v44  ;;  %4192 = vmatprep.mubr.msk.bf16.mxu1 %vm740_vm3, %v5347_v44  ;;  %v391_v54 = vsel %vm5278_vm4, %v386_v45, %v390_v26  ;;  %v409_v55 = vor.u32 %v408_v46, %v405_v33  ;;  %v424_v56 = vrot.slane %v422_v47, 5  ;;  %v430_v58 = vshll.u32 %v5341_v36, 16  ;;  %v5401_v45 = vld [vmem:[%s5229_s26 + $0x58] sm:$0xf]  ;;  %p4926_p7 = pnand %p4925_p3, %p4919_p8 }
  0x75   : > { %4357 = vmatpush3.bf16.msra.mxu0 %v2122_v9  ;;  %v401_v0 = vsel %vm5278_vm4, %v396_v49, %v400_v32  ;;  %v419_v1 = vor.u32 %v418_v51, %v414_v50  ;;  %v429_v3 = vrot.slane %v427_v53, 4  ;;  %v436_v8 = vshll.u32 %v5351_v48, 16 }
  0x76   : > { %v5372_v10 = vcombine.low %v391_v54, %v401_v0  ;;  %v410_v11 = vrot.slane %v409_v55, 4  ;;  %v432_v12 = vrot.slane %v430_v58, 5  ;;  %v440_v15 = vshrl.u32 %v5351_v48, 16  ;;  %4757 = vmatprep.subr.msk.bf16.mxu0 %vm789_vm0, %v5367_v63  ;;  %v5413_v55 = vld [vmem:[%s5229_s26 + $0x5c] sm:$0x1] }
  0x77   : > { %v420_v9 = vrot.slane %v419_v1, 4  ;;  %v438_v17 = vrot.slane %v436_v8, 5  ;;  %v446_v18 = vshll.u32 %v5354_v52, 16  ;;  %v451_v20 = vshrl.u32 %v5365_v59, 16  ;;  %v5418_v8 = vld [vmem:[%s5229_s26 + $0x60] sm:$0xf] }
  0x78   : > { %6560 = vst [vmem:[#allocation17_spill] sm:$0xff] %v5372_v10  ;;  %4328 = vmatprep.mubr.msk.bf16.mxu0 %vm740_vm3, %v5372_v10  ;;  %4193 = vmatmul.mubr.msk.bf16.gmra.mrb[4].mxu1 %vm740_vm3, %v5372_v10  ;;  %v415_v21 = vsel %vm5278_vm4, %v410_v11, %v414_v50  ;;  %v433_v23 = vor.u32 %v432_v12, %v429_v3  ;;  %v442_v24 = vrot.slane %v440_v15, 4  ;;  %v454_v26 = vshll.u32 %v5365_v59, 16 }
  0x79   : > { %v425_v31 = vsel %vm5278_vm4, %v420_v9, %v424_v56  ;;  %v448_v32 = vrot.slane %v446_v18, 5  ;;  %v453_v33 = vrot.slane %v451_v20, 4  ;;  %v460_v35 = vshll.u32 %v5376_v16, 16 }
  0x7a   : > { %vm1262_vm5 = vcmask 1042432   ;;  %vm1263_vm6 = vcmask 1046532   ;;  %v5398_v37 = vcombine.low %v415_v21, %v425_v31  ;;  %v434_v38 = vrot.slane %v433_v23, 4 }
  0x7b   : > { %v443_v40 = vor.u32 %v442_v24, %v438_v17  ;;  %v456_v42 = vrot.slane %v454_v26, 5  ;;  %v462_v46 = vrot.slane %v460_v35, 5  ;;  %v464_v47 = vshrl.u32 %v5376_v16, 16  ;;  %vm5456_vm7 = vmor %vm1262_vm5, %vm1263_vm6 }
  0x7c   : > { %6561 = vst [vmem:[#allocation18_spill] sm:$0xff] %v5398_v37  ;;  %v470_v49 = vshll.u32 %v5389_v25, 16  ;;  %v475_v50 = vshrl.u32 %v5393_v27, 16  ;;  %4329 = vmatmul.mubr.msk.bf16.gmra.mrb[4].mxu0 %vm740_vm3, %v5398_v37  ;;  %4196 = vmatprep.mubr.msk.bf16.mxu1 %vm740_vm3, %v5398_v37  ;;  %v439_v51 = vsel %vm5278_vm4, %v434_v38, %v438_v17  ;;  %v478_v56 = vshll.u32 %v5393_v27, 16  ;;  %v5424_v17 = vld [vmem:[%s5229_s26 + $0x64] sm:$0xf] }
  0x7d   : > { %v444_v53 = vrot.slane %v443_v40, 4  ;;  %v457_v54 = vor.u32 %v456_v42, %v453_v33  ;;  %v466_v58 = vrot.slane %v464_v47, 4  ;;  %v484_v3 = vshll.u32 %v5401_v45, 16  ;;  %v5432_v33 = vld [vmem:[%s5229_s26 + $0x68] sm:$0x1] }
  0x7e   : > { %v472_v0 = vrot.slane %v470_v49, 5  ;;  %v477_v1 = vrot.slane %v475_v50, 4  ;;  %v480_v15 = vrot.slane %v478_v56, 5  ;;  %v488_v9 = vshrl.u32 %v5401_v45, 16 }
  0x7f   : > { %v449_v11 = vsel %vm5278_vm4, %v444_v53, %v448_v32  ;;  %v458_v12 = vrot.slane %v457_v54, 4  ;;  %v467_v20 = vor.u32 %v466_v58, %v462_v46  ;;  %v486_v21 = vrot.slane %v484_v3, 5 }
  0x80   : > { %v5426_v18 = vcombine.low %v439_v51, %v449_v11  ;;  %v494_v23 = vshll.u32 %v5413_v55, 16  ;;  %v481_v26 = vor.u32 %v480_v15, %v477_v1  ;;  %v490_v31 = vrot.slane %v488_v9, 4  ;;  %v5443_v51 = vld [vmem:[%s5229_s26 + $0x6c] sm:$0xf]  ;;  %v5448_v1 = vld [vmem:[#allocation5 + $0x4] sm:$0x3] }
  0x81   : > { %v463_v24 = vsel %vm5278_vm4, %v458_v12, %v462_v46  ;;  %v499_v32 = vshrl.u32 %v5418_v8, 16  ;;  %v468_v35 = vrot.slane %v467_v20, 4  ;;  %v502_v40 = vshll.u32 %v5418_v8, 16  ;;  %4752 = vmatprep.subr.msk.bf16.mxu1 %vm789_vm0, %v5448_v1 }
  0x82   : > { %6562 = vst [vmem:[#allocation19_spill] sm:$0xff] %v5426_v18  ;;  %4332 = vmatprep.mubr.msk.bf16.mxu0 %vm740_vm3, %v5426_v18  ;;  %4197 = vmatmul.mubr.msk.bf16.gmra.mrb[8].mxu1 %vm740_vm3, %v5426_v18  ;;  %v496_v38 = vrot.slane %v494_v23, 5  ;;  %v508_v42 = vshll.u32 %v5424_v17, 16  ;;  %v482_v47 = vrot.slane %v481_v26, 4  ;;  %v491_v46 = vor.u32 %v490_v31, %v486_v21  ;;  %v5465_v26 = vld [vmem:[%s5229_s26 + $0x70] sm:$0xf] }
  0x83   : > { %v501_v49 = vrot.slane %v499_v32, 4  ;;  %v512_v50 = vshrl.u32 %v5424_v17, 16  ;;  %v473_v53 = vsel %vm5278_vm4, %v468_v35, %v472_v0  ;;  %v504_v54 = vrot.slane %v502_v40, 5  ;;  %v5474_v32 = vld [vmem:[%s5229_s26 + $0x74] sm:$0x1] }
  0x84   : > { %v510_v56 = vrot.slane %v508_v42, 5  ;;  %v518_v58 = vshll.u32 %v5432_v33, 16  ;;  %v5450_v3 = vcombine.low %v463_v24, %v473_v53  ;;  %v487_v11 = vsel %vm5278_vm4, %v482_v47, %v486_v21 }
  0x85   : > { %v492_v12 = vrot.slane %v491_v46, 4  ;;  %v514_v15 = vrot.slane %v512_v50, 4  ;;  %v505_v0 = vor.u32 %v504_v54, %v501_v49  ;;  %v3715_v23 = vrot.slane %v5259_v13, 9 }
  0x86   : > { %6563 = vst [vmem:[#allocation20_spill] sm:$0xff] %v5450_v3  ;;  %v520_v20 = vrot.slane %v518_v58, 5  ;;  %v1274_v24 = vrot.slane %v5262_v14, 5  ;;  %4333 = vmatmul.mubr.msk.bf16.gmra.mrb[8].mxu0 %vm740_vm3, %v5450_v3  ;;  %4200 = vmatprep.mubr.msk.bf16.mxu1 %vm740_vm3, %v5450_v3  ;;  %v523_v35 = vshrl.u32 %v5443_v51, 16  ;;  %v526_v13 = vshll.u32 %v5443_v51, 16 }
  0x87   : > { %v497_v21 = vsel %vm5278_vm4, %v492_v12, %v496_v38  ;;  %v515_v31 = vor.u32 %v514_v15, %v510_v56  ;;  %v506_v40 = vrot.slane %v505_v0, 4  ;;  %v532_v38 = vshll.u32 %v5465_v26, 16  ;;  %v5496_v12 = vld [vmem:[%s5229_s26 + $0x78] sm:$0xf] }
  0x88   : > { %v5478_v14 = vcombine.low %v487_v11, %v497_v21  ;;  %v1275_v42 = vsel %vm5456_vm7, %v3715_v23, %v1274_v24  ;;  %v1276_v47 = vrot.slane %v1274_v24, 4  ;;  %v525_v49 = vrot.slane %v523_v35, 4 }
  0x89   : > { %v516_v46 = vrot.slane %v515_v31, 4  ;;  %v528_v50 = vrot.slane %v526_v13, 5  ;;  %v511_v53 = vsel %vm5278_vm4, %v506_v40, %v510_v56  ;;  %v536_v58 = vshrl.u32 %v5465_v26, 16  ;;  %v5503_v56 = vld [vmem:[%s5229_s26 + $0x7c] sm:$0xf] }
  0x8a   : > { %6566 = vst [vmem:[#allocation21_spill] sm:$0xff] %v5478_v14  ;;  %4336 = vmatprep.mubr.msk.bf16.mxu0 %vm740_vm3, %v5478_v14  ;;  %4201 = vmatmul.mubr.msk.bf16.gmra.mrb[12].mxu1 %vm740_vm3, %v5478_v14  ;;  %v1278_v54 = vsel %vm5456_vm7, %v1276_v47, %v1277_v41  ;;  %v542_v11 = vshll.u32 %v5474_v32, 16  ;;  %v534_v24 = vrot.slane %v532_v38, 5  ;;  %v3716_v31 = vrot.slane %v5274_v29, 9 }
  0x8b   : > { %v521_v15 = vsel %vm5278_vm4, %v516_v46, %v520_v20  ;;  %v5500_v0 = vcombine.low %v1275_v42, %v1278_v54  ;;  %v529_v23 = vor.u32 %v528_v50, %v525_v49  ;;  %v538_v21 = vrot.slane %v536_v58, 4  ;;  %v5520_v46 = vld [vmem:[%s5229_s26 + $0x80] sm:$0x1]  ;;  %v5534_v54 = vld [vmem:[%s5229_s26 + $0x84] sm:$0xf] }
  0x8c   : > { %v5505_v19 = vcombine.low %v511_v53, %v521_v15  ;;  %v544_v41 = vrot.slane %v542_v11, 5  ;;  %v1283_v13 = vrot.slane %v1281_v60, 4  ;;  %v2328_v20 = vsel %vm789_vm0, %v5367_v63, 0 }
  0x8d   : > { %6567 = vst [vmem:[#allocation22_spill] sm:$0xff] %v5500_v0  ;;  %v530_v35 = vrot.slane %v529_v23, 4  ;;  %v547_v40 = vshrl.u32 %v5496_v12, 16  ;;  %v539_v42 = vor.u32 %v538_v21, %v534_v24  ;;  %v1282_v47 = vsel %vm5456_vm7, %v3716_v31, %v1281_v60 }
  0x8e   : > { %6568 = vst [vmem:[#allocation23_spill] sm:$0xff] %v5505_v19  ;;  %4204 = vmatprep.mubr.msk.bf16.mxu1 %vm740_vm3, %v5505_v19  ;;  %v550_v49 = vshll.u32 %v5496_v12, 16  ;;  %v556_v50 = vshll.u32 %v5503_v56, 16  ;;  %4337 = vmatmul.mubr.msk.bf16.gmra.mrb[12].mxu0 %vm740_vm3, %v5505_v19  ;;  %v1285_v38 = vsel %vm5456_vm7, %v1283_v13, %v1284_v61  ;;  %v560_v60 = vshrl.u32 %v5503_v56, 16 }
  0x8f   : > { %v535_v63 = vsel %vm5278_vm4, %v530_v35, %v534_v24  ;;  %v549_v53 = vrot.slane %v547_v40, 4  ;;  %4358 = vmatprep.mubr.msk.bf16.mxu0 %vm740_vm3, %v5500_v0  ;;  %v540_v58 = vrot.slane %v539_v42, 4  ;;  %v5538_v11 = vcombine.low %v1282_v47, %v1285_v38  ;;  %v5547_v40 = vld [vmem:[%s5229_s26 + $0x88] sm:$0xf]  ;;  %v5550_v42 = vld [vmem:[%s5229_s26 + $0x8c] sm:$0x1] }
  0x90   : > { %v552_v15 = vrot.slane %v550_v49, 5  ;;  %v558_v23 = vrot.slane %v556_v50, 5  ;;  %v562_v24 = vrot.slane %v560_v60, 4  ;;  %v566_v43 = vshll.u32 %v5520_v46, 16 }
  0x91   : > { %6569 = vst [vmem:[#allocation24_spill] sm:$0xff] %v5538_v11  ;;  %v3717_v61 = vrot.slane %v5304_v57, 9  ;;  %v1288_v21 = vrot.slane %v5312_v62, 5  ;;  %v545_v31 = vsel %vm5278_vm4, %v540_v58, %v544_v41  ;;  %v1291_v13 = vrot.slane %v5317_v6, 5 }
  0x92   : > { %v553_v35 = vor.u32 %v552_v15, %v549_v53  ;;  %v571_v47 = vshrl.u32 %v5534_v54, 16  ;;  %v5553_v49 = vcombine.low %v535_v63, %v545_v31  ;;  %v563_v50 = vor.u32 %v562_v24, %v558_v23  ;;  %v5569_v31 = vld [vmem:[%s5229_s26 + $0x90] sm:$0xf] }
  0x93   : > { %v568_v38 = vrot.slane %v566_v43, 5  ;;  %v1289_v60 = vsel %vm5456_vm7, %v3717_v61, %v1288_v21  ;;  %v1290_v19 = vrot.slane %v1288_v21, 4  ;;  %v574_v53 = vshll.u32 %v5534_v54, 16 }
  0x94   : > { %6570 = vst [vmem:[#allocation25_spill] sm:$0xff] %v5553_v49  ;;  %v554_v4 = vrot.slane %v553_v35, 4  ;;  %v573_v41 = vrot.slane %v571_v47, 4  ;;  %4205 = vmatmul.mubr.msk.bf16.gmra.mrb[16].mxu1 %vm740_vm3, %v5553_v49  ;;  %v564_v6 = vrot.slane %v563_v50, 4  ;;  %v580_v58 = vshll.u32 %v5547_v40, 16 }
  0x95   : > { %v584_v63 = vshrl.u32 %v5547_v40, 16  ;;  %v590_v15 = vshll.u32 %v5550_v42, 16  ;;  %v1292_v43 = vsel %vm5456_vm7, %v1290_v19, %v1291_v13  ;;  %v576_v61 = vrot.slane %v574_v53, 5  ;;  %v5571_v35 = vld [vmem:[#allocation5 + $0xe] sm:$0x3] }
  0x96   : > { %v559_v24 = vsel %vm5278_vm4, %v554_v4, %v558_v23  ;;  %v3718_v21 = vrot.slane %v5320_v7, 9  ;;  %6571 = vst [vmem:[#allocation26_spill] sm:$0xff] %v5571_v35  ;;  %4359 = vmatmul.mubr.msk.bf16.vlgmr.msra.gmra.mrb[0].mxu0 %vm740_vm3, %v5538_v11  ;;  %v569_v47 = vsel %vm5278_vm4, %v564_v6, %v568_v38  ;;  %v5577_v50 = vcombine.low %v1289_v60, %v1292_v43  ;;  %v5580_v49 = vld [vmem:[%s5229_s26 + $0x94] sm:$0xf]  ;;  %v5589_v38 = vld [vmem:[%s5229_s26 + $0x98] sm:$0x1] }
  0x97   : > { %v582_v4 = vrot.slane %v580_v58, 5  ;;  %v586_v23 = vrot.slane %v584_v63, 4  ;;  %4391 = vmatpush3.bf16.msra.mxu0 %v2328_v20  ;;  %v5582_v19 = vcombine.low %v559_v24, %v569_v47  ;;  %v577_v13 = vor.u32 %v576_v61, %v573_v41 }
  0x98   : > { %6572 = vst [vmem:[#allocation27_spill] sm:$0xff] %v5577_v50  ;;  %v592_v53 = vrot.slane %v590_v15, 5  ;;  %v1295_v14 = vrot.slane %v5331_v22, 5  ;;  %4362 = vmatprep.mubr.msk.bf16.mxu0 %vm740_vm3, %v5577_v50  ;;  %v1298_v18 = vrot.slane %v5337_v28, 5  ;;  %v595_v60 = vshrl.u32 %v5569_v31, 16  ;;  %4758 = vmatprep.subr.msk.bf16.mxu0 %vm789_vm0, %v5571_v35 }
  0x99   : > { %6573 = vst [vmem:[#allocation28_spill] sm:$0xff] %v5582_v19  ;;  %v587_v3 = vor.u32 %v586_v23, %v582_v4  ;;  %v598_v6 = vshll.u32 %v5569_v31, 16  ;;  %4208 = vmatprep.mubr.msk.bf16.mxu1 %vm740_vm3, %v5582_v19  ;;  %v578_v20 = vrot.slane %v577_v13, 4  ;;  %v604_v28 = vshll.u32 %v5580_v49, 16  ;;  %v5614_v19 = vld [vmem:[%s5229_s26 + $0xa0] sm:$0xf] }
  0x9a   : > { %v1296_v41 = vsel %vm5456_vm7, %v3718_v21, %v1295_v14  ;;  %v1297_v58 = vrot.slane %v1295_v14, 4  ;;  %v597_v15 = vrot.slane %v595_v60, 4  ;;  %v608_v43 = vshrl.u32 %v5580_v49, 16  ;;  %v5607_v21 = vld [vmem:[%s5229_s26 + $0x9c] sm:$0xf] }
  0x9b   : > { %v588_v63 = vrot.slane %v587_v3, 4  ;;  %v600_v24 = vrot.slane %v598_v6, 5  ;;  %v583_v61 = vsel %vm5278_vm4, %v578_v20, %v582_v4  ;;  %v606_v23 = vrot.slane %v604_v28, 5  ;;  %v5680_v50 = vld [vmem:[%s5229_s26 + $0xb8] sm:$0xf] }
  0x9c   : > { %v1299_v47 = vsel %vm5456_vm7, %v1297_v58, %v1298_v18  ;;  %v614_v13 = vshll.u32 %v5589_v38, 16  ;;  %v610_v6 = vrot.slane %v608_v43, 4  ;;  %v3719_v18 = vrot.slane %v5341_v36, 9 }
  0x9d   : > { %v593_v14 = vsel %vm5278_vm4, %v588_v63, %v592_v53  ;;  %v5611_v3 = vcombine.low %v1296_v41, %v1299_v47  ;;  %v601_v60 = vor.u32 %v600_v24, %v597_v15  ;;  %v1302_v20 = vrot.slane %v5351_v48, 5  ;;  %v5624_v41 = vld [vmem:[%s5229_s26 + $0xa4] sm:$0x1] }
  0x9e   : > { %v5616_v37 = vcombine.low %v583_v61, %v593_v14  ;;  %v616_v4 = vrot.slane %v614_v13, 5  ;;  %v611_v28 = vor.u32 %v610_v6, %v606_v23  ;;  %v1305_v53 = vrot.slane %v5354_v52, 5 }
  0x9f   : > { %6574 = vst [vmem:[#allocation29_spill] sm:$0xff] %v5611_v3  ;;  %4363 = vmatmul.mubr.msk.bf16.gmra.mrb[4].mxu0 %vm740_vm3, %v5611_v3  ;;  %v602_v58 = vrot.slane %v601_v60, 4  ;;  %v619_v63 = vshrl.u32 %v5607_v21, 16  ;;  %v1303_v15 = vsel %vm5456_vm7, %v3719_v18, %v1302_v20  ;;  %v1304_v24 = vrot.slane %v1302_v20, 4  ;;  %v5640_v20 = vld [vmem:[%s5229_s26 + $0xa8] sm:$0xf] }
  0xa0   : > { %6575 = vst [vmem:[#allocation30_spill] sm:$0xff] %v5616_v37  ;;  %4209 = vmatmul.mubr.msk.bf16.gmra.mrb[20].mxu1 %vm740_vm3, %v5616_v37  ;;  %v622_v43 = vshll.u32 %v5607_v21, 16  ;;  %v628_v61 = vshll.u32 %v5614_v19, 16  ;;  %v612_v47 = vrot.slane %v611_v28, 4  ;;  %v632_v14 = vshrl.u32 %v5614_v19, 16 }
  0xa1   : > { %v607_v52 = vsel %vm5278_vm4, %v602_v58, %v606_v23  ;;  %v621_v13 = vrot.slane %v619_v63, 4  ;;  %v1306_v60 = vsel %vm5456_vm7, %v1304_v24, %v1305_v53  ;;  %v638_v18 = vshll.u32 %v5624_v41, 16  ;;  %v5648_v28 = vld [vmem:[%s5229_s26 + $0xac] sm:$0xf] }
  0xa2   : > { %v624_v6 = vrot.slane %v622_v43, 5  ;;  %v630_v37 = vrot.slane %v628_v61, 5  ;;  %v617_v10 = vsel %vm5278_vm4, %v612_v47, %v616_v4  ;;  %v5644_v44 = vcombine.low %v1303_v15, %v1306_v60  ;;  %v5657_v4 = vld [vmem:[%s5229_s26 + $0xb0] sm:$0x1] }
  0xa3   : > { %v634_v23 = vrot.slane %v632_v14, 4  ;;  %v3720_v58 = vrot.slane %v5365_v59, 9  ;;  %v5650_v63 = vcombine.low %v607_v52, %v617_v10  ;;  %v640_v24 = vrot.slane %v638_v18, 5 }
  0xa4   : > { %6576 = vst [vmem:[#allocation31_spill] sm:$0xff] %v5644_v44  ;;  %v625_v53 = vor.u32 %v624_v6, %v621_v13  ;;  %v1309_v43 = vrot.slane %v5376_v16, 5  ;;  %4366 = vmatprep.mubr.msk.bf16.mxu0 %vm740_vm3, %v5644_v44  ;;  %v1312_v3 = vrot.slane %v5389_v25, 5  ;;  %v643_v15 = vshrl.u32 %v5640_v20, 16 }
  0xa5   : > { %6577 = vst [vmem:[#allocation32_spill] sm:$0xff] %v5650_v63  ;;  %v635_v61 = vor.u32 %v634_v23, %v630_v37  ;;  %v646_v47 = vshll.u32 %v5640_v20, 16  ;;  %4212 = vmatprep.mubr.msk.bf16.mxu1 %vm740_vm3, %v5650_v63  ;;  %v652_v14 = vshll.u32 %v5648_v28, 16  ;;  %v656_v18 = vshrl.u32 %v5648_v28, 16 }
  0xa6   : > { %v626_v10 = vrot.slane %v625_v53, 4  ;;  %v1310_v52 = vsel %vm5456_vm7, %v3720_v58, %v1309_v43  ;;  %v1311_v13 = vrot.slane %v1309_v43, 4  ;;  %v645_v25 = vrot.slane %v643_v15, 4  ;;  %v5673_v58 = vld [vmem:[%s5229_s26 + $0xb4] sm:$0xf] }
  0xa7   : > { %v636_v60 = vrot.slane %v635_v61, 4  ;;  %v648_v6 = vrot.slane %v646_v47, 5  ;;  %v654_v63 = vrot.slane %v652_v14, 5  ;;  %v662_v53 = vshll.u32 %v5657_v4, 16 }
  0xa8   : > { %v631_v23 = vsel %vm5278_vm4, %v626_v10, %v630_v37  ;;  %v1313_v44 = vsel %vm5456_vm7, %v1311_v13, %v1312_v3  ;;  %v658_v47 = vrot.slane %v656_v18, 4  ;;  %v3721_v3 = vrot.slane %v5393_v27, 9 }
  0xa9   : > { %v641_v43 = vsel %vm5278_vm4, %v636_v60, %v640_v24  ;;  %v5677_v61 = vcombine.low %v1310_v52, %v1313_v44  ;;  %v649_v15 = vor.u32 %v648_v6, %v645_v25  ;;  %v664_v37 = vrot.slane %v662_v53, 5  ;;  %v5690_v44 = vld [vmem:[%s5229_s26 + $0xbc] sm:$0x1] }
  0xaa   : > { %v5682_v11 = vcombine.low %v631_v23, %v641_v43  ;;  %v1316_v10 = vrot.slane %v5401_v45, 5  ;;  %v659_v14 = vor.u32 %v658_v47, %v654_v63  ;;  %v1319_v24 = vrot.slane %v5413_v55, 5 }
  0xab   : > { %6578 = vst [vmem:[#allocation33_spill] sm:$0xff] %v5677_v61  ;;  %4367 = vmatmul.mubr.msk.bf16.gmra.mrb[8].mxu0 %vm740_vm3, %v5677_v61  ;;  %v650_v13 = vrot.slane %v649_v15, 4  ;;  %v667_v52 = vshrl.u32 %v5673_v58, 16  ;;  %v670_v6 = vshll.u32 %v5673_v58, 16  ;;  %v676_v18 = vshll.u32 %v5680_v50, 16 }
  0xac   : > { %6579 = vst [vmem:[#allocation34_spill] sm:$0xff] %v5682_v11  ;;  %4213 = vmatmul.mubr.msk.bf16.gmra.mrb[24].mxu1 %vm740_vm3, %v5682_v11  ;;  %v1317_v60 = vsel %vm5456_vm7, %v3721_v3, %v1316_v10  ;;  %v1318_v25 = vrot.slane %v1316_v10, 4  ;;  %v660_v53 = vrot.slane %v659_v14, 4  ;;  %v680_v43 = vshrl.u32 %v5680_v50, 16 }
  0xad   : > { %v655_v23 = vsel %vm5278_vm4, %v650_v13, %v654_v63  ;;  %v669_v55 = vrot.slane %v667_v52, 4  ;;  %v672_v47 = vrot.slane %v670_v6, 5  ;;  %v678_v11 = vrot.slane %v676_v18, 5 }
  0xae   : > { %v1320_v15 = vsel %vm5456_vm7, %v1318_v25, %v1319_v24  ;;  %v686_v61 = vshll.u32 %v5690_v44, 16  ;;  %v665_v3 = vsel %vm5278_vm4, %v660_v53, %v664_v37  ;;  %v682_v0 = vrot.slane %v680_v43, 4 }
  0xaf   : > { %v5707_v10 = vcombine.low %v1317_v60, %v1320_v15  ;;  %v3722_v35 = vrot.slane %v5418_v8, 9  ;;  %v5710_v63 = vcombine.low %v655_v23, %v665_v3  ;;  %v673_v13 = vor.u32 %v672_v47, %v669_v55 }
  0xb0   : > { %v688_v14 = vrot.slane %v686_v61, 5  ;;  %v1323_v52 = vrot.slane %v5424_v17, 5  ;;  %v683_v24 = vor.u32 %v682_v0, %v678_v11  ;;  %v1326_v25 = vrot.slane %v5432_v33, 5 }
  0xb1   : > { %4370 = vmatprep.mubr.msk.bf16.mxu0 %vm740_vm3, %v5707_v10  ;;  %v3723_v6 = vrot.slane %v5443_v51, 9  ;;  %v1330_v37 = vrot.slane %v5465_v26, 5  ;;  %4216 = vmatprep.mubr.msk.bf16.mxu1 %vm740_vm3, %v5710_v63  ;;  %v674_v60 = vrot.slane %v673_v13, 4  ;;  %v1333_v23 = vrot.slane %v5474_v32, 5 }
  0xb2   : > { %v1324_v18 = vsel %vm5456_vm7, %v3722_v35, %v1323_v52  ;;  %v1325_v61 = vrot.slane %v1323_v52, 4  ;;  %v684_v53 = vrot.slane %v683_v24, 4  ;;  %v3682_v0 = vcombine.low %v5240_v2, %v5249_v5 }
  0xb3   : > { %v1331_v33 = vsel %vm5456_vm7, %v3723_v6, %v1330_v37  ;;  %v1332_v55 = vrot.slane %v1330_v37, 4  ;;  %v679_v43 = vsel %vm5278_vm4, %v674_v60, %v678_v11  ;;  %v3724_v47 = vrot.slane %v5496_v12, 9 }
  0xb4   : > { %v1327_v15 = vsel %vm5456_vm7, %v1325_v61, %v1326_v25  ;;  %v1337_v35 = vrot.slane %v5503_v56, 5  ;;  %v689_v32 = vsel %vm5278_vm4, %v684_v53, %v688_v14  ;;  %v1340_v5 = vrot.slane %v5520_v46, 5 }
  0xb5   : > { %v5735_v3 = vcombine.low %v1324_v18, %v1327_v15  ;;  %v1334_v2 = vsel %vm5456_vm7, %v1332_v55, %v1333_v23  ;;  %v5740_v13 = vcombine.low %v679_v43, %v689_v32  ;;  %v3725_v14 = vrot.slane %v5534_v54, 9 }
  0xb6   : > { %v5742_v11 = vcombine.low %v1331_v33, %v1334_v2  ;;  %v1339_v52 = vrot.slane %v1337_v35, 4  ;;  %v1338_v24 = vsel %vm5456_vm7, %v3724_v47, %v1337_v35  ;;  %v1344_v25 = vrot.slane %v5547_v40, 5 }
  0xb7   : > { %4371 = vmatmul.mubr.msk.bf16.gmra.mrb[12].mxu0 %vm740_vm3, %v5735_v3  ;;  %v1347_v6 = vrot.slane %v5550_v42, 5  ;;  %4217 = vmatmul.mubr.msk.bf16.gmra.mrb[28].mxu1 %vm740_vm3, %v5740_v13  ;;  %v1351_v37 = vrot.slane %v5580_v49, 5  ;;  %v3726_v42 = vrot.slane %v5569_v31, 9  ;;  %v1354_v33 = vrot.slane %v5589_v38, 5 }
  0xb8   : > { %4374 = vmatprep.mubr.msk.bf16.mxu0 %vm740_vm3, %v5742_v11  ;;  %v1341_v46 = vsel %vm5456_vm7, %v1339_v52, %v1340_v5  ;;  %4222 = vmatprep.mubr.msk.bf16.mxu1 %vm740_vm3, %v3682_v0  ;;  %v1345_v60 = vsel %vm5456_vm7, %v3725_v14, %v1344_v25  ;;  %v1346_v18 = vrot.slane %v1344_v25, 4  ;;  %v1358_v55 = vrot.slane %v5614_v19, 5 }
  0xb9   : > { %v5761_v61 = vcombine.low %v1338_v24, %v1341_v46  ;;  %v1353_v53 = vrot.slane %v1351_v37, 4  ;;  %v5772_v0 = vcombine.low %v5274_v29, %v5287_v39  ;;  %v3727_v15 = vrot.slane %v5607_v21, 9  ;;  %v5785_v39 = vld [vmem:[#allocation5 + $0x6] sm:$0x3] }
  0xba   : > { %v1348_v23 = vsel %vm5456_vm7, %v1346_v18, %v1347_v6  ;;  %v1360_v47 = vrot.slane %v1358_v55, 4  ;;  %v1361_v35 = vrot.slane %v5624_v41, 5  ;;  %v1476_v32 = vsel %vm789_vm0, %v5448_v1, 0 }
  0xbb   : > { %v5768_v43 = vcombine.low %v1345_v60, %v1348_v23  ;;  %v1365_v2 = vrot.slane %v5648_v28, 5  ;;  %v1352_v38 = vsel %vm5456_vm7, %v3726_v42, %v1351_v37  ;;  %v1355_v29 = vsel %vm5456_vm7, %v1353_v53, %v1354_v33 }
  0xbc   : > { %v1372_v1 = vrot.slane %v5680_v50, 5  ;;  %v5796_v41 = vcombine.low %v5304_v57, %v5312_v62  ;;  %v1359_v5 = vsel %vm5456_vm7, %v3727_v15, %v1358_v55  ;;  %v1362_v52 = vsel %vm5456_vm7, %v1360_v47, %v1361_v35 }
  0xbd   : > { %v3728_v24 = vrot.slane %v5640_v20, 9  ;;  %v5803_v14 = vcombine.low %v1352_v38, %v1355_v29  ;;  %v1367_v25 = vrot.slane %v1365_v2, 4  ;;  %v1368_v6 = vrot.slane %v5657_v4, 5 }
  0xbe   : > { %v5808_v46 = vcombine.low %v5443_v51, %v5465_v26  ;;  %v3729_v57 = vrot.slane %v5673_v58, 9  ;;  %v1375_v62 = vrot.slane %v5690_v44, 5  ;;  %v5816_v37 = vcombine.low %v5496_v12, %v5503_v56  ;;  %v5825_v26 = vld [vmem:[%s5229_s26 + $0xc4] sm:$0xf] }
  0xbf   : > { %4375 = vmatmul.mubr.msk.bf16.gmra.mrb[16].mxu0 %vm740_vm3, %v5761_v61  ;;  %4223 = vmatmul.mubr.msk.bf16.vlgmr.msra.gmra.mrb[0].mxu1 %vm740_vm3, %v5284_v34  ;;  %v5820_v60 = vcombine.low %v5534_v54, %v5547_v40  ;;  %v5822_v4 = vcombine.low %v1359_v5, %v1362_v52  ;;  %v1374_v51 = vrot.slane %v1372_v1, 4  ;;  %v5829_v18 = vcombine.low %v5569_v31, %v5580_v49  ;;  %v5852_v49 = vld [vmem:[%s5229_s26 + $0xc0] sm:$0xf] }
  0xc0   : > { %4378 = vmatprep.mubr.msk.bf16.mxu0 %vm740_vm3, %v5768_v43  ;;  %4255 = vmatpush3.bf16.msra.mxu1 %v1476_v32  ;;  %v5833_v44 = vcombine.low %v5607_v21, %v5614_v19  ;;  %v5837_v12 = vcombine.low %v5320_v7, %v5331_v22  ;;  %v5841_v56 = vcombine.low %v5640_v20, %v5648_v28  ;;  %v2108_v31 = vrot.slane %v5825_v26, 5  ;;  %v298_v19 = vld [vmem:[%s5229_s26 + $0xc8] sm:$0x1] }
  0xc1   : > { %4226 = vmatprep.mubr.msk.bf16.mxu1 %vm740_vm3, %v5772_v0  ;;  %4753 = vmatprep.subr.msk.bf16.mxu1 %vm789_vm0, %v5785_v39  ;;  %v5845_v54 = vcombine.low %v5673_v58, %v5680_v50  ;;  %v1366_v40 = vsel %vm5456_vm7, %v3728_v24, %v1365_v2  ;;  %v1369_v7 = vsel %vm5456_vm7, %v1367_v25, %v1368_v6  ;;  %v3796_v20 = vrot.slane %v5852_v49, 9 }
  0xc2   : > { %v1373_v22 = vsel %vm5456_vm7, %v3729_v57, %v1372_v1  ;;  %v1376_v50 = vsel %vm5456_vm7, %v1374_v51, %v1375_v62  ;;  %v5870_v21 = vcombine.low %v5341_v36, %v5351_v48  ;;  %v5873_v28 = vcombine.low %v1366_v40, %v1369_v7 }
  0xc3   : > { %v5875_v58 = vcombine.low %v1373_v22, %v1376_v50  ;;  %v2110_v42 = vrot.slane %v2108_v31, 4  ;;  %v2111_v23 = vrot.slane %v298_v19, 5  ;;  %v1878_v53 = vshrl.u32 %v5852_v49, 16  ;;  %v4856_v22 = vld [vmem:[%s5229_s26] sm:$0xf] }
  0xc4   : > { %v1881_v33 = vshll.u32 %v5852_v49, 16  ;;  %v1887_v55 = vshll.u32 %v5825_v26, 16  ;;  %v1891_v15 = vshrl.u32 %v5825_v26, 16  ;;  %v5883_v36 = vcombine.low %v5365_v59, %v5376_v16 }
  0xc5   : > { %v1880_v48 = vrot.slane %v1878_v53, 4  ;;  %v2109_v2 = vsel %vm5456_vm7, %v3796_v20, %v2108_v31  ;;  %v2112_v59 = vsel %vm5456_vm7, %v2110_v42, %v2111_v23  ;;  %v1897_v29 = vshll.u32 %v298_v19, 16  ;;  %v4855_v31 = vld [vmem:[%s5229_s26 + $0x8] sm:$0x1] }
  0xc6   : > { %v1883_v47 = vrot.slane %v1881_v33, 5  ;;  %v1889_v35 = vrot.slane %v1887_v55, 5  ;;  %v1893_v32 = vrot.slane %v1891_v15, 4  ;;  %v5897_v24 = vcombine.low %v2109_v2, %v2112_v59  ;;  %v6581_v33 = vld [vmem:[#allocation22_spill] sm:$0xff]  ;;  %v6582_v55 = vld [vmem:[#allocation24_spill] sm:$0xff]  ;;  %v6586_v59 = vld [vmem:[#allocation33_spill] sm:$0xff] }
  0xc7   : > { %4379 = vmatmul.mubr.msk.bf16.gmra.mrb[20].mxu0 %vm740_vm3, %v5803_v14  ;;  %4227 = vmatmul.mubr.msk.bf16.gmra.mrb[4].mxu1 %vm740_vm3, %v5796_v41  ;;  %v1899_v52 = vrot.slane %v1897_v29, 5  ;;  %v5901_v25 = vcombine.low %v5393_v27, %v5401_v45  ;;  %v5909_v62 = vcombine.low %v5418_v8, %v5424_v17  ;;  %v6580_v27 = vld [vmem:[#allocation26_spill] sm:$0xff]  ;;  %v1270_v7 = vrot.slane %v4855_v31, 5  ;;  %v4857_v15 = vld [vmem:[#allocation5 + $0x8] sm:$0x3]  ;;  %v6597_v31 = vld [vmem:[#allocation32_spill] sm:$0xff] }
  0xc8   : > { %4382 = vmatprep.mubr.msk.bf16.mxu0 %vm740_vm3, %v5822_v4  ;;  %4230 = vmatprep.mubr.msk.bf16.mxu1 %vm740_vm3, %v5837_v12  ;;  %v1884_v16 = vor.u32 %v1883_v47, %v1880_v48  ;;  %v1894_v38 = vor.u32 %v1893_v32, %v1889_v35  ;;  %v2556_v45 = vsel %vm789_vm0, %v6580_v27, 0  ;;  %v2760_v8 = vld [vmem:[#allocation5 + $0x10] sm:$0x3]  ;;  %v4854_v17 = vld [vmem:[%s5229_s26 + $0x4] sm:$0xf]  ;;  %v3714_v50 = vrot.slane %v4856_v22, 9 }
  0xc9   : > { %v1267_v40 = vrot.slane %v4854_v17, 5  ;;  %v1682_v53 = vsel %vm789_vm0, %v5785_v39, 0  ;;  %v6583_v39 = vld [vmem:[#allocation27_spill] sm:$0xff]  ;;  %v6584_v48 = vld [vmem:[#allocation29_spill] sm:$0xff]  ;;  %v5983_v47 = vcombine.low %v5852_v49, %v5825_v26  ;;  %v6587_v49 = vld [vmem:[#allocation16_spill] sm:$0xff] }
  0xca   : > { %v1885_v1 = vrot.slane %v1884_v16, 4  ;;  %v1895_v5 = vrot.slane %v1894_v38, 4  ;;  %v5992_v32 = vld [vmem:[%s5229_s26 + $0xcc] sm:$0xf]  ;;  %v5995_v2 = vld [vmem:[%s5229_s26 + $0xd0] sm:$0xf] }
  0xcb   : > { %v1269_v19 = vrot.slane %v1267_v40, 4  ;;  %v1268_v20 = vsel %vm5456_vm7, %v3714_v50, %v1267_v40  ;;  %v3814_v26 = vcombine.low %v5992_v32, %v5995_v2  ;;  %v2768_v16 = vsel %vm789_vm0, %v2760_v8, 0  ;;  %v6588_v38 = vld [vmem:[#allocation17_spill] sm:$0xff]  ;;  %v6589_v29 = vld [vmem:[#allocation18_spill] sm:$0xff]  ;;  %v6595_v27 = vld [vmem:[#allocation28_spill] sm:$0xff] }
  0xcc   : > { %v1890_v6 = vsel %vm5278_vm4, %v1885_v1, %v1889_v35  ;;  %v1900_v57 = vsel %vm5278_vm4, %v1895_v5, %v1899_v52  ;;  %v6585_v35 = vld [vmem:[#allocation31_spill] sm:$0xff]  ;;  %v6591_v5 = vld [vmem:[#allocation20_spill] sm:$0xff]  ;;  %v6592_v52 = vld [vmem:[#allocation21_spill] sm:$0xff]  ;;  %v2527_v17 = vshll.u32 %v5992_v32, 16  ;;  %v2537_v40 = vshrl.u32 %v5995_v2, 16 }
  0xcd   : > { %v5911_v51 = vcombine.low %v1890_v6, %v1900_v57  ;;  %v1271_v42 = vsel %vm5456_vm7, %v1269_v19, %v1270_v7  ;;  %v6590_v1 = vld [vmem:[#allocation19_spill] sm:$0xff]  ;;  %v6594_v57 = vld [vmem:[#allocation25_spill] sm:$0xff]  ;;  %v2533_v7 = vshll.u32 %v5995_v2, 16  ;;  %v2754_v30 = vrot.slane %v5995_v2, 5 }
  0xce   : > { %v3730_v23 = vcombine.low %v1268_v20, %v1271_v42  ;;  %v6593_v6 = vld [vmem:[#allocation23_spill] sm:$0xff]  ;;  %v2529_v50 = vrot.slane %v2527_v17, 5  ;;  %v2539_v20 = vrot.slane %v2537_v40, 4 }
  0xcf   : > { %4383 = vmatmul.mubr.msk.bf16.gmra.mrb[24].mxu0 %vm740_vm3, %v5873_v28  ;;  %4231 = vmatmul.mubr.msk.bf16.gmra.mrb[8].mxu1 %vm740_vm3, %v5870_v21  ;;  %v6598_v22 = vld [vmem:[#allocation15_spill] sm:$0xff]  ;;  %v2535_v19 = vrot.slane %v2533_v7, 5 }
  0xd0   : > { %4386 = vmatprep.mubr.msk.bf16.mxu0 %vm740_vm3, %v5875_v58  ;;  %4234 = vmatprep.mubr.msk.bf16.mxu1 %vm740_vm3, %v5883_v36  ;;  %v301_v42 = vld [vmem:[%s5229_s26 + $0xd4] sm:$0x1] }
  0xd7   : > { %4387 = vmatmul.mubr.msk.bf16.gmra.mrb[28].mxu0 %vm740_vm3, %v5897_v24  ;;  %4235 = vmatmul.mubr.msk.bf16.gmra.mrb[12].mxu1 %vm740_vm3, %v5901_v25 }
  0xd8   : > { %4392 = vmatprep.mubr.msk.bf16.mxu0 %vm740_vm3, %v5772_v0  ;;  %4238 = vmatprep.mubr.msk.bf16.mxu1 %vm740_vm3, %v5909_v62 }
  0xdf   : > { %4393 = vmatmul.mubr.msk.bf16.vlgmr.msra.gmra.mrb[0].mxu0 %vm740_vm3, %v5796_v41  ;;  %4239 = vmatmul.mubr.msk.bf16.gmra.mrb[16].mxu1 %vm740_vm3, %v5808_v46 }
  0xe0   : > { %4425 = vmatpush3.bf16.msra.mxu0 %v2556_v45  ;;  %4242 = vmatprep.mubr.msk.bf16.mxu1 %vm740_vm3, %v5816_v37  ;;  %v6596_v45 = vld [vmem:[#allocation30_spill] sm:$0xff] }
  0xe1   : > { %4396 = vmatprep.mubr.msk.bf16.mxu0 %vm740_vm3, %v5837_v12  ;;  %4759 = vmatprep.subr.msk.bf16.mxu0 %vm789_vm0, %v2760_v8  ;;  %v2524_v8 = vshrl.u32 %v5992_v32, 16 }
  0xe7   : > { %4397 = vmatmul.mubr.msk.bf16.gmra.mrb[4].mxu0 %vm740_vm3, %v5870_v21  ;;  %4243 = vmatmul.mubr.msk.bf16.gmra.mrb[20].mxu1 %vm740_vm3, %v5820_v60 }
  0xe8   : > { %4400 = vmatprep.mubr.msk.bf16.mxu0 %vm740_vm3, %v5883_v36  ;;  %4246 = vmatprep.mubr.msk.bf16.mxu1 %vm740_vm3, %v5829_v18 }
  0xef   : > { %4401 = vmatmul.mubr.msk.bf16.gmra.mrb[8].mxu0 %vm740_vm3, %v5901_v25  ;;  %4247 = vmatmul.mubr.msk.bf16.gmra.mrb[24].mxu1 %vm740_vm3, %v5833_v44 }
  0xf0   : > { %4404 = vmatprep.mubr.msk.bf16.mxu0 %vm740_vm3, %v5909_v62  ;;  %4250 = vmatprep.mubr.msk.bf16.mxu1 %vm740_vm3, %v5841_v56 }
  0xf7   : > { %4405 = vmatmul.mubr.msk.bf16.gmra.mrb[12].mxu0 %vm740_vm3, %v5808_v46  ;;  %4251 = vmatmul.mubr.msk.bf16.gmra.mrb[28].mxu1 %vm740_vm3, %v5845_v54 }
  0xf8   : > { %4408 = vmatprep.mubr.msk.bf16.mxu0 %vm740_vm3, %v5816_v37  ;;  %4256 = vmatprep.mubr.msk.bf16.mxu1 %vm740_vm3, %v3730_v23  ;;  %v6599_v23 = vld [vmem:[#allocation34_spill] sm:$0xff] }
  0xff   : > { %4409 = vmatmul.mubr.msk.bf16.gmra.mrb[16].mxu0 %vm740_vm3, %v5820_v60  ;;  %4257 = vmatmul.mubr.msk.bf16.vlgmr.msra.gmra.mrb[0].mxu1 %vm740_vm3, %v6581_v33  ;;  %v2543_v33 = vshll.u32 %v301_v42, 16 }
 0x100   : > { %4412 = vmatprep.mubr.msk.bf16.mxu0 %vm740_vm3, %v5829_v18  ;;  %4289 = vmatpush3.bf16.msra.mxu1 %v1682_v53  ;;  %v2540_v53 = vor.u32 %v2539_v20, %v2535_v19 }
 0x101   : > { %4260 = vmatprep.mubr.msk.bf16.mxu1 %vm740_vm3, %v6582_v55  ;;  %4755 = vmatprep.subr.msk.bf16.mxu1 %vm789_vm0, %v4857_v15 }
 0x102   : > { %v2541_v15 = vrot.slane %v2540_v53, 4 }
 0x107   : > { %4413 = vmatmul.mubr.msk.bf16.gmra.mrb[20].mxu0 %vm740_vm3, %v5833_v44  ;;  %4261 = vmatmul.mubr.msk.bf16.gmra.mrb[4].mxu1 %vm740_vm3, %v6583_v39 }
 0x108   : > { %4416 = vmatprep.mubr.msk.bf16.mxu0 %vm740_vm3, %v5841_v56  ;;  %4264 = vmatprep.mubr.msk.bf16.mxu1 %vm740_vm3, %v6584_v48 }
 0x10f   : > { %4417 = vmatmul.mubr.msk.bf16.gmra.mrb[24].mxu0 %vm740_vm3, %v5845_v54  ;;  %4265 = vmatmul.mubr.msk.bf16.gmra.mrb[8].mxu1 %vm740_vm3, %v6585_v35 }
 0x110   : > { %4420 = vmatprep.mubr.msk.bf16.mxu0 %vm740_vm3, %v5983_v47  ;;  %4268 = vmatprep.mubr.msk.bf16.mxu1 %vm740_vm3, %v6586_v59 }
 0x117   : > { %4421 = vmatmul.mubr.msk.bf16.gmra.mrb[28].mxu0 %vm740_vm3, %v3814_v26  ;;  %4269 = vmatmul.mubr.msk.bf16.gmra.mrb[12].mxu1 %vm740_vm3, %v5707_v10  ;;  %v2545_v26 = vrot.slane %v2543_v33, 5 }
 0x118   : > { %4426 = vmatprep.mubr.msk.bf16.mxu0 %vm740_vm3, %v6587_v49  ;;  %4272 = vmatprep.mubr.msk.bf16.mxu1 %vm740_vm3, %v5735_v3 }
 0x119   : > { %v2546_v49 = vsel %vm5278_vm4, %v2541_v15, %v2545_v26 }
 0x11f   : > { %4427 = vmatmul.mubr.msk.bf16.vlgmr.msra.gmra.mrb[0].mxu0 %vm740_vm3, %v6588_v38  ;;  %4273 = vmatmul.mubr.msk.bf16.gmra.mrb[16].mxu1 %vm740_vm3, %v5742_v11 }
 0x120   : > { %4459 = vmatpush3.bf16.msra.mxu0 %v2768_v16  ;;  %4276 = vmatprep.mubr.msk.bf16.mxu1 %vm740_vm3, %v5761_v61 }
 0x121   : > { %4430 = vmatprep.mubr.msk.bf16.mxu0 %vm740_vm3, %v6589_v29 }
 0x127   : > { %4431 = vmatmul.mubr.msk.bf16.gmra.mrb[4].mxu0 %vm740_vm3, %v6590_v1  ;;  %4277 = vmatmul.mubr.msk.bf16.gmra.mrb[20].mxu1 %vm740_vm3, %v5768_v43 }
 0x128   : > { %4434 = vmatprep.mubr.msk.bf16.mxu0 %vm740_vm3, %v6591_v5  ;;  %4280 = vmatprep.mubr.msk.bf16.mxu1 %vm740_vm3, %v5803_v14 }
 0x12f   : > { %4435 = vmatmul.mubr.msk.bf16.gmra.mrb[8].mxu0 %vm740_vm3, %v6592_v52  ;;  %4281 = vmatmul.mubr.msk.bf16.gmra.mrb[24].mxu1 %vm740_vm3, %v5822_v4 }
 0x130   : > { %4438 = vmatprep.mubr.msk.bf16.mxu0 %vm740_vm3, %v6593_v6  ;;  %4284 = vmatprep.mubr.msk.bf16.mxu1 %vm740_vm3, %v5873_v28 }
 0x137   : > { %4439 = vmatmul.mubr.msk.bf16.gmra.mrb[12].mxu0 %vm740_vm3, %v6594_v57  ;;  %4285 = vmatmul.mubr.msk.bf16.gmra.mrb[28].mxu1 %vm740_vm3, %v5875_v58 }
 0x138   : > { %4442 = vmatprep.mubr.msk.bf16.mxu0 %vm740_vm3, %v6595_v27  ;;  %4290 = vmatprep.mubr.msk.bf16.mxu1 %vm740_vm3, %v5284_v34  ;;  %v2526_v34 = vrot.slane %v2524_v8, 4 }
 0x13f   : > { %4443 = vmatmul.mubr.msk.bf16.gmra.mrb[16].mxu0 %vm740_vm3, %v6596_v45  ;;  %4291 = vmatmul.mubr.msk.bf16.vlgmr.msra.gmra.mrb[0].mxu1 %vm740_vm3, %v5772_v0  ;;  %v2530_v0 = vor.u32 %v2529_v50, %v2526_v34 }
 0x140   : > { %4446 = vmatprep.mubr.msk.bf16.mxu0 %vm740_vm3, %v6597_v31  ;;  %4493 = vmatpush3.bf16.msra.mxu1 %v6598_v22 }
 0x141   : > { %4294 = vmatprep.mubr.msk.bf16.mxu1 %vm740_vm3, %v5796_v41  ;;  %v2531_v41 = vrot.slane %v2530_v0, 4 }
 0x147   : > { %4447 = vmatmul.mubr.msk.bf16.gmra.mrb[20].mxu0 %vm740_vm3, %v6599_v23  ;;  %4295 = vmatmul.mubr.msk.bf16.gmra.mrb[4].mxu1 %vm740_vm3, %v5837_v12  ;;  %v2536_v12 = vsel %vm5278_vm4, %v2531_v41, %v2535_v19 }
 0x148   : > { %4450 = vmatprep.mubr.msk.bf16.mxu0 %vm740_vm3, %v5710_v63  ;;  %4298 = vmatprep.mubr.msk.bf16.mxu1 %vm740_vm3, %v5870_v21  ;;  %v3831_v21 = vcombine.low %v2536_v12, %v2546_v49 }
 0x14f   : > { %4451 = vmatmul.mubr.msk.bf16.gmra.mrb[24].mxu0 %vm740_vm3, %v5740_v13  ;;  %4299 = vmatmul.mubr.msk.bf16.gmra.mrb[8].mxu1 %vm740_vm3, %v5883_v36 }
 0x150   : > { %4454 = vmatprep.mubr.msk.bf16.mxu0 %vm740_vm3, %v5911_v51  ;;  %4302 = vmatprep.mubr.msk.bf16.mxu1 %vm740_vm3, %v5901_v25 }
 0x157   : > { %4455 = vmatmul.mubr.msk.bf16.gmra.mrb[28].mxu0 %vm740_vm3, %v3831_v21  ;;  %4303 = vmatmul.mubr.msk.bf16.gmra.mrb[12].mxu1 %vm740_vm3, %v5909_v62 }
 0x158   : > { %4460 = vmatprep.mubr.msk.bf16.mxu0 %vm740_vm3, %v6582_v55  ;;  %4306 = vmatprep.mubr.msk.bf16.mxu1 %vm740_vm3, %v5808_v46 }
 0x15f   : > { %4461 = vmatmul.mubr.msk.bf16.vlgmr.msra.gmra.mrb[0].mxu0 %vm740_vm3, %v6583_v39  ;;  %4307 = vmatmul.mubr.msk.bf16.gmra.mrb[16].mxu1 %vm740_vm3, %v5816_v37 }
 0x160   : > { %4464 = vmatprep.mubr.msk.bf16.mxu0 %vm740_vm3, %v6584_v48  ;;  %4310 = vmatprep.mubr.msk.bf16.mxu1 %vm740_vm3, %v5820_v60 }
 0x167   : > { %4465 = vmatmul.mubr.msk.bf16.gmra.mrb[4].mxu0 %vm740_vm3, %v6585_v35  ;;  %4311 = vmatmul.mubr.msk.bf16.gmra.mrb[20].mxu1 %vm740_vm3, %v5829_v18 }
 0x168   : > { %4468 = vmatprep.mubr.msk.bf16.mxu0 %vm740_vm3, %v6586_v59  ;;  %4314 = vmatprep.mubr.msk.bf16.mxu1 %vm740_vm3, %v5833_v44 }
 0x16f   : > { %4469 = vmatmul.mubr.msk.bf16.gmra.mrb[8].mxu0 %vm740_vm3, %v5707_v10  ;;  %4315 = vmatmul.mubr.msk.bf16.gmra.mrb[24].mxu1 %vm740_vm3, %v5841_v56  ;;  %v3848_v10 = vrot.slane %v5992_v32, 9 }
 0x170   : > { %4472 = vmatprep.mubr.msk.bf16.mxu0 %vm740_vm3, %v5735_v3  ;;  %4318 = vmatprep.mubr.msk.bf16.mxu1 %vm740_vm3, %v5845_v54  ;;  %v2756_v3 = vrot.slane %v2754_v30, 4 }
 0x177   : > { %4473 = vmatmul.mubr.msk.bf16.gmra.mrb[12].mxu0 %vm740_vm3, %v5742_v11  ;;  %4319 = vmatmul.mubr.msk.bf16.gmra.mrb[28].mxu1 %vm740_vm3, %v5983_v47  ;;  %v2757_v11 = vrot.slane %v301_v42, 5 }
 0x178   : > { %4476 = vmatprep.mubr.msk.bf16.mxu0 %vm740_vm3, %v5761_v61  ;;  %4340 = vmatprep.mubr.msk.bf16.mxu1 %vm740_vm3, %v6594_v57  ;;  %v2755_v61 = vsel %vm5456_vm7, %v3848_v10, %v2754_v30 }
 0x17f   : > { %4477 = vmatmul.mubr.msk.bf16.gmra.mrb[16].mxu0 %vm740_vm3, %v5768_v43  ;;  %4341 = vmatmul.mubr.msk.bf16.vlgmr.msra.gmra.mrb[16].mxu1 %vm740_vm3, %v6595_v27  ;;  %v2758_v43 = vsel %vm5456_vm7, %v2756_v3, %v2757_v11 }
 0x180   : > { %4480 = vmatprep.mubr.msk.bf16.mxu0 %vm740_vm3, %v5803_v14  ;;  %4344 = vmatprep.mubr.msk.bf16.mxu1 %vm740_vm3, %v6596_v45  ;;  %v3849_v14 = vcombine.low %v2755_v61, %v2758_v43 }
 0x187   : > { %4481 = vmatmul.mubr.msk.bf16.gmra.mrb[20].mxu0 %vm740_vm3, %v5822_v4  ;;  %4345 = vmatmul.mubr.msk.bf16.gmra.mrb[20].mxu1 %vm740_vm3, %v6597_v31 }
 0x188   : > { %4484 = vmatprep.mubr.msk.bf16.mxu0 %vm740_vm3, %v5873_v28  ;;  %4348 = vmatprep.mubr.msk.bf16.mxu1 %vm740_vm3, %v6599_v23 }
 0x18f   : > { %4485 = vmatmul.mubr.msk.bf16.gmra.mrb[24].mxu0 %vm740_vm3, %v5875_v58  ;;  %4349 = vmatmul.mubr.msk.bf16.gmra.mrb[24].mxu1 %vm740_vm3, %v5710_v63 }
 0x190   : > { %4488 = vmatprep.mubr.msk.bf16.mxu0 %vm740_vm3, %v5897_v24  ;;  %4352 = vmatprep.mubr.msk.bf16.mxu1 %vm740_vm3, %v5740_v13 }
 0x197   : > { %4489 = vmatmul.mubr.msk.bf16.gmra.mrb[28].mxu0 %vm740_vm3, %v3849_v14  ;;  %4353 = vmatmul.mubr.msk.bf16.gmra.mrb[28].mxu1 %vm740_vm3, %v5911_v51 }
 0x212   : > { %v4292_v46 = vpop.f32.mrb[0].mxu1 }
 0x213   : > { %v1718_v63 = vpop.f32.mrb[1].mxu1 }
 0x214   : > { %v4293_v37 = vpop.f32.mrb[2].mxu1 }
 0x215   : > { %v1721_v60 = vpop.f32.mrb[3].mxu1 }
 0x21a   : > { %v4296_v4 = vpop.f32.mrb[4].mxu1 }
 0x21b   : > { %v1734_v18 = vpop.f32.mrb[5].mxu1 }
 0x21c   : > { %v4297_v44 = vpop.f32.mrb[6].mxu1 }
 0x21d   : > { %v1737_v56 = vpop.f32.mrb[7].mxu1 }
 0x222   : > { %v4300_v9 = vpop.f32.mrb[8].mxu1 }
 0x223   : > { %v1750_v54 = vpop.f32.mrb[9].mxu1 }
 0x224   : > { %v4301_v28 = vpop.f32.mrb[10].mxu1 }
 0x225   : > { %v1753_v58 = vpop.f32.mrb[11].mxu1 }
 0x22a   : > { %v4304_v13 = vpop.f32.mrb[12].mxu1 }
 0x22b   : > { %v1766_v36 = vpop.f32.mrb[13].mxu1 }
 0x22c   : > { %v4305_v24 = vpop.f32.mrb[14].mxu1 }
 0x22d   : > { %v1769_v25 = vpop.f32.mrb[15].mxu1 }
 0x232   : > { %v4462_v62 = vpop.f32.mrb[0].mxu0 }
 0x233   : > { %v6147_v55 = vadd.f32 %v4462_v62, %v4292_v46  ;;  %v2804_v51 = vpop.f32.mrb[1].mxu0 }
 0x234   : > { %v6150_v39 = vadd.f32 %v2804_v51, %v1718_v63  ;;  %v4463_v48 = vpop.f32.mrb[2].mxu0 }
 0x235   : > { %v6152_v47 = vadd.f32 %v4463_v48, %v4293_v37  ;;  %v2807_v35 = vpop.f32.mrb[3].mxu0 }
 0x236   : > { %v6154_v32 = vadd.f32 %v2807_v35, %v1721_v60 }
 0x237   : > { %v3946_v2 = vpack.c.bf16 %v6152_v47, %v6147_v55 }
 0x238   : > { %v3941_v59 = vpack.c.bf16 %v6154_v32, %v6150_v39  ;;  %v3284_v16 = vadd.f32 %v6154_v32, %v6150_v39 }
 0x239   : > { %4018 = vst [vmem:[%s6162_s23 + $0x8] sm:$0xff] %v3946_v2  }
 0x23a   : > { %3942 = vst [vmem:[%s6162_s23] sm:$0xff] %v3941_v59   ;;  %v3285_v38 = vadd.f32 %v6147_v55, %v3284_v16  ;;  %v4466_v29 = vpop.f32.mrb[4].mxu0 }
 0x23b   : > { %v6167_v1 = vadd.f32 %v4466_v29, %v4296_v4  ;;  %v2820_v5 = vpop.f32.mrb[5].mxu0 }
 0x23c   : > { %v6169_v52 = vadd.f32 %v2820_v5, %v1734_v18  ;;  %v3286_v6 = vadd.f32 %v6152_v47, %v3285_v38  ;;  %v4467_v57 = vpop.f32.mrb[6].mxu0 }
 0x23d   : > { %v6172_v27 = vadd.f32 %v4467_v57, %v4297_v44  ;;  %v2823_v45 = vpop.f32.mrb[7].mxu0 }
 0x23e   : > { %v3287_v8 = vadd.f32 %v6169_v52, %v3286_v6  ;;  %v6175_v17 = vadd.f32 %v2823_v45, %v1737_v56 }
 0x23f   : > { %v3956_v40 = vpack.c.bf16 %v6172_v27, %v6167_v1 }
 0x240   : > { %v3951_v31 = vpack.c.bf16 %v6175_v17, %v6169_v52  ;;  %v3288_v7 = vadd.f32 %v6175_v17, %v3287_v8 }
 0x241   : > { %4020 = vst [vmem:[%s6162_s23 + $0x18] sm:$0xff] %v3956_v40  }
 0x242   : > { %4019 = vst [vmem:[%s6162_s23 + $0x10] sm:$0xff] %v3951_v31   ;;  %v3289_v22 = vadd.f32 %v6167_v1, %v3288_v7  ;;  %v4470_v34 = vpop.f32.mrb[8].mxu0 }
 0x243   : > { %v6185_v50 = vadd.f32 %v4470_v34, %v4300_v9  ;;  %v2836_v19 = vpop.f32.mrb[9].mxu0 }
 0x244   : > { %v6187_v20 = vadd.f32 %v2836_v19, %v1750_v54  ;;  %v3290_v42 = vadd.f32 %v6172_v27, %v3289_v22  ;;  %v4471_v23 = vpop.f32.mrb[10].mxu0 }
 0x245   : > { %v6190_v0 = vadd.f32 %v4471_v23, %v4301_v28  ;;  %v2839_v53 = vpop.f32.mrb[11].mxu0 }
 0x246   : > { %v3291_v33 = vadd.f32 %v6187_v20, %v3290_v42  ;;  %v6193_v41 = vadd.f32 %v2839_v53, %v1753_v58 }
 0x247   : > { %v3966_v15 = vpack.c.bf16 %v6190_v0, %v6185_v50 }
 0x248   : > { %v3961_v26 = vpack.c.bf16 %v6193_v41, %v6187_v20  ;;  %v3292_v12 = vadd.f32 %v6193_v41, %v3291_v33 }
 0x249   : > { %4022 = vst [vmem:[%s6162_s23 + $0x28] sm:$0xff] %v3966_v15  }
 0x24a   : > { %4021 = vst [vmem:[%s6162_s23 + $0x20] sm:$0xff] %v3961_v26   ;;  %v3293_v49 = vadd.f32 %v6185_v50, %v3292_v12  ;;  %v4474_v21 = vpop.f32.mrb[12].mxu0 }
 0x24b   : > { %v6203_v30 = vadd.f32 %v4474_v21, %v4304_v13  ;;  %v2852_v10 = vpop.f32.mrb[13].mxu0 }
 0x24c   : > { %v6205_v3 = vadd.f32 %v2852_v10, %v1766_v36  ;;  %v3294_v11 = vadd.f32 %v6190_v0, %v3293_v49  ;;  %v4475_v61 = vpop.f32.mrb[14].mxu0 }
 0x24d   : > { %v6208_v43 = vadd.f32 %v4475_v61, %v4305_v24  ;;  %v2855_v14 = vpop.f32.mrb[15].mxu0 }
 0x24e   : > { %v3295_v46 = vadd.f32 %v6205_v3, %v3294_v11  ;;  %v6211_v63 = vadd.f32 %v2855_v14, %v1769_v25 }
 0x24f   : > { %v3976_v37 = vpack.c.bf16 %v6208_v43, %v6203_v30 }
 0x250   : > { %v3971_v60 = vpack.c.bf16 %v6211_v63, %v6205_v3  ;;  %v3296_v4 = vadd.f32 %v6211_v63, %v3295_v46 }
 0x251   : > { %4024 = vst [vmem:[%s6162_s23 + $0x38] sm:$0xff] %v3976_v37  }
 0x252   : > { %4023 = vst [vmem:[%s6162_s23 + $0x30] sm:$0xff] %v3971_v60   ;;  %v3297_v18 = vadd.f32 %v6203_v30, %v3296_v4  ;;  %v4478_v44 = vpop.f32.mrb[16].mxu0  ;;  %v4342_v56 = vpop.f32.mrb[16].mxu1 }
 0x253   : > { %v2868_v9 = vpop.f32.mrb[17].mxu0  ;;  %v6221_v54 = vadd.f32 %v4478_v44, %v4342_v56  ;;  %v2010_v28 = vpop.f32.mrb[17].mxu1 }
 0x254   : > { %v3298_v58 = vadd.f32 %v6208_v43, %v3297_v18  ;;  %v4479_v13 = vpop.f32.mrb[18].mxu0  ;;  %v6224_v36 = vadd.f32 %v2868_v9, %v2010_v28  ;;  %v4343_v24 = vpop.f32.mrb[18].mxu1 }
 0x255   : > { %v2871_v25 = vpop.f32.mrb[19].mxu0  ;;  %v6226_v62 = vadd.f32 %v4479_v13, %v4343_v24  ;;  %v2013_v51 = vpop.f32.mrb[19].mxu1 }
 0x256   : > { %v3299_v48 = vadd.f32 %v6224_v36, %v3298_v58  ;;  %v6229_v35 = vadd.f32 %v2871_v25, %v2013_v51 }
 0x257   : > { %v3986_v2 = vpack.c.bf16 %v6226_v62, %v6221_v54 }
 0x258   : > { %v3981_v59 = vpack.c.bf16 %v6229_v35, %v6224_v36  ;;  %v3300_v16 = vadd.f32 %v6229_v35, %v3299_v48 }
 0x259   : > { %4026 = vst [vmem:[%s6162_s23 + $0x48] sm:$0xff] %v3986_v2  }
 0x25a   : > { %v4482_v38 = vpop.f32.mrb[20].mxu0  ;;  %4025 = vst [vmem:[%s6162_s23 + $0x40] sm:$0xff] %v3981_v59   ;;  %v3301_v29 = vadd.f32 %v6221_v54, %v3300_v16  ;;  %v4346_v5 = vpop.f32.mrb[20].mxu1 }
 0x25b   : > { %v2884_v6 = vpop.f32.mrb[21].mxu0  ;;  %v6239_v57 = vadd.f32 %v4482_v38, %v4346_v5  ;;  %v2026_v45 = vpop.f32.mrb[21].mxu1 }
 0x25c   : > { %v4483_v8 = vpop.f32.mrb[22].mxu0  ;;  %v6241_v40 = vadd.f32 %v2884_v6, %v2026_v45  ;;  %v3302_v31 = vadd.f32 %v6226_v62, %v3301_v29  ;;  %v4347_v7 = vpop.f32.mrb[22].mxu1 }
 0x25d   : > { %v2887_v22 = vpop.f32.mrb[23].mxu0  ;;  %v6244_v34 = vadd.f32 %v4483_v8, %v4347_v7  ;;  %v2029_v19 = vpop.f32.mrb[23].mxu1 }
 0x25e   : > { %v3303_v42 = vadd.f32 %v6241_v40, %v3302_v31  ;;  %v6247_v23 = vadd.f32 %v2887_v22, %v2029_v19 }
 0x25f   : > { %v3996_v53 = vpack.c.bf16 %v6244_v34, %v6239_v57 }
 0x260   : > { %v3991_v33 = vpack.c.bf16 %v6247_v23, %v6241_v40  ;;  %v3304_v15 = vadd.f32 %v6247_v23, %v3303_v42 }
 0x261   : > { %4028 = vst [vmem:[%s6162_s23 + $0x58] sm:$0xff] %v3996_v53  }
 0x262   : > { %v4486_v26 = vpop.f32.mrb[24].mxu0  ;;  %4027 = vst [vmem:[%s6162_s23 + $0x50] sm:$0xff] %v3991_v33   ;;  %v3305_v12 = vadd.f32 %v6239_v57, %v3304_v15  ;;  %v4350_v49 = vpop.f32.mrb[24].mxu1 }
 0x263   : > { %v2900_v21 = vpop.f32.mrb[25].mxu0  ;;  %v6257_v10 = vadd.f32 %v4486_v26, %v4350_v49  ;;  %v2042_v11 = vpop.f32.mrb[25].mxu1 }
 0x264   : > { %v4487_v61 = vpop.f32.mrb[26].mxu0  ;;  %v6259_v14 = vadd.f32 %v2900_v21, %v2042_v11  ;;  %v3306_v46 = vadd.f32 %v6244_v34, %v3305_v12  ;;  %v4351_v37 = vpop.f32.mrb[26].mxu1 }
 0x265   : > { %v2903_v60 = vpop.f32.mrb[27].mxu0  ;;  %v6262_v4 = vadd.f32 %v4487_v61, %v4351_v37  ;;  %v2045_v18 = vpop.f32.mrb[27].mxu1 }
 0x266   : > { %v3307_v44 = vadd.f32 %v6259_v14, %v3306_v46  ;;  %v6265_v56 = vadd.f32 %v2903_v60, %v2045_v18 }
 0x267   : > { %v4006_v9 = vpack.c.bf16 %v6262_v4, %v6257_v10 }
 0x268   : > { %v4001_v28 = vpack.c.bf16 %v6265_v56, %v6259_v14  ;;  %v3308_v58 = vadd.f32 %v6265_v56, %v3307_v44 }
 0x269   : > { %4030 = vst [vmem:[%s6162_s23 + $0x68] sm:$0xff] %v4006_v9  }
 0x26a   : > { %v4490_v13 = vpop.f32.mrb[28].mxu0  ;;  %4029 = vst [vmem:[%s6162_s23 + $0x60] sm:$0xff] %v4001_v28   ;;  %v3309_v24 = vadd.f32 %v6257_v10, %v3308_v58  ;;  %v4354_v25 = vpop.f32.mrb[28].mxu1 }
 0x26b   : > { %v2916_v51 = vpop.f32.mrb[29].mxu0  ;;  %v6275_v48 = vadd.f32 %v4490_v13, %v4354_v25  ;;  %v2058_v2 = vpop.f32.mrb[29].mxu1 }
 0x26c   : > { %v4491_v59 = vpop.f32.mrb[30].mxu0  ;;  %v6277_v16 = vadd.f32 %v2916_v51, %v2058_v2  ;;  %v3310_v38 = vadd.f32 %v6262_v4, %v3309_v24  ;;  %v4355_v29 = vpop.f32.mrb[30].mxu1 }
 0x26d   : > { %v2919_v5 = vpop.f32.mrb[31].mxu0  ;;  %v6282_v6 = vadd.f32 %v4491_v59, %v4355_v29  ;;  %v2061_v45 = vpop.f32.mrb[31].mxu1 }
 0x26e   : > { %v3311_v8 = vadd.f32 %v6277_v16, %v3310_v38  ;;  %v6285_v31 = vadd.f32 %v2919_v5, %v2061_v45 }
 0x26f   : > { %v4016_v7 = vpack.c.bf16 %v6282_v6, %v6275_v48 }
 0x270   : > { %v4011_v22 = vpack.c.bf16 %v6285_v31, %v6277_v16  ;;  %v3312_v19 = vadd.f32 %v6285_v31, %v3311_v8 }
 0x271   : > { %4032 = vst [vmem:[%s6162_s23 + $0x78] sm:$0xff] %v4016_v7  }
 0x272   : > { %4031 = vst [vmem:[%s6162_s23 + $0x70] sm:$0xff] %v4011_v22   ;;  %v3313_v42 = vadd.f32 %v6275_v48, %v3312_v19 }
 0x273   : > { %4929 = shalt.err (!%p4926_p7)
}
 0x274   : > { %s4930_s24 = scalar_lea.hbm %s6292_s6, 2048  ;;  %s4934_s21 = scalar_lea.hbm %s6509_s2, 4096 }
 0x275   : > { %p4931_p9 = scmp.ne.s32.totalorder %s6292_s6, %s4930_s24  ;;  %p4935_p5 = scmp.lt.u32.totalorder %s6292_s6, %s6509_s2 }
 0x276   : > { %p4936_p11 = scmp.lt.u32.totalorder %s4934_s21, %s4930_s24  ;;  %p4938_p4 = scmp.lt.u32.totalorder %s4930_s24, %s6292_s6 }
 0x277   : > { %p4932_p2 = pnand %p4931_p9, %p5177_p12 }
 0x278   : > { %p4937_p1 = por %p4936_p11, %p4935_p5 }
 0x279   : > { %p4933_p0 = pneg %p4932_p2 }
 0x27a   : > { %p4939_p6 = por %p4938_p4, %p4937_p1 }
 0x27c   : > { %p4940_p8 = pnand %p4939_p6, %p4933_p0 }
 0x27e   : > { %4943 = shalt.err (!%p4940_p8)
}
 0x27f   : > { %s5055_s29 = smov 64   ;;  %s5056_s11 = smov 4   ;;  %v3314_v53 = vadd.f32 %v6282_v6, %v3313_v42 }
 0x280   : > { %4769 = dma.vmem_to_hbm [thread:$0]  (%p5177_p12), %s6294_s25, 2048, %s6292_s6, %s3459_s8, %s5055_s29, %s5055_s29, %s5056_s11  }
 0x281   : > { %v3315_v33 = vrot.slane %v3314_v53, 4  ;;  %s3463_s9 = sand.u32 1, %s5105_s19   ;;  %s3901_s28 = sshll.u32 %s5105_s19, 4 }
 0x282   : > { %s240_s12 = scalar_lea.vmem [#allocation8], %s5225_s14  ;;  %s6335_s26 = scalar_lea.hbm %s6510_s3, %s3901_s28 }
 0x283   : > { %v3316_v15 = vadd.f32 %v3315_v33, %v3314_v53  ;;  %s3496_s13 = sshll.u32 %s240_s12, 4  ;;  %s6341_s25 = scalar_lea.sflag [#allocation9], %s3463_s9  ;;  %s6337_s13 = int_to_ptr.vmem [resolvable:$true] %s3496_s13 }
 0x284   : > { %s4944_s6 = scalar_lea.vmem %s6337_s13, 16  ;;  %s5057_s8 = smov [#allocation8]  }
 0x285   : > { %v3317_v26 = vrot.slane %v3316_v15, 2  ;;  %p4945_p10 = scmp.ne.s32.totalorder %s6337_s13, %s4944_s6  ;;  %s4948_s21 = sshll.u32 %s5057_s8, 4  ;;  %s4949_s21 = int_to_ptr.vmem [resolvable:$false] %s4948_s21 }
 0x286   : > { %s4950_s23 = scalar_lea.vmem %s4949_s21, 32  ;;  %p4951_p7 = scmp.lt.s32.totalorder %s6337_s13, %s4949_s21 }
 0x287   : > { %v3318_v12 = vadd.f32 %v3317_v26, %v3316_v15  ;;  %p4946_p13 = pnand %p4945_p10, %p5177_p12  ;;  %p4952_p9 = scmp.lt.s32.totalorder %s4950_s23, %s4944_s6 }
 0x289   : > { %v3319_v49 = vrot.slane %v3318_v12, 1  ;;  %p4947_p3 = pneg %p4946_p13  ;;  %p4953_p2 = por %p4952_p9, %p4951_p7 }
 0x28b   : > { %v3320_v21 = vadd.f32 %v3319_v49, %v3318_v12  ;;  %p4954_p0 = pnand %p4953_p2, %p4947_p3 }
 0x28d   : > { %v6339_v11 = vmul.f32 0.00390625, %v3320_v21  ;;  %3387 = vst [vmem:[%s240_s12] sm:$0x1] %v3320_v21 }
 0x28e   : > { %4957 = shalt.err (!%p4954_p0)
}
 0x28f   : > { %s4958_s10 = scalar_lea.hbm %s6335_s26, 16  ;;  %s4962_s9 = scalar_lea.hbm %s6510_s3, 32 }
 0x290   : > { %p4959_p5 = scmp.ne.s32.totalorder %s6335_s26, %s4958_s10  ;;  %p4963_p4 = scmp.lt.u32.totalorder %s6335_s26, %s6510_s3 }
 0x291   : > { %p4964_p6 = scmp.lt.u32.totalorder %s4962_s9, %s4958_s10  ;;  %p4966_p10 = scmp.lt.u32.totalorder %s4958_s10, %s6335_s26 }
 0x292   : > { %p4960_p11 = pnand %p4959_p5, %p5177_p12 }
 0x293   : > { %p4965_p8 = por %p4964_p6, %p4963_p4 }
 0x294   : > { %p4961_p1 = pneg %p4960_p11 }
 0x295   : > { %p4967_p13 = por %p4966_p10, %p4965_p8 }
 0x297   : > { %p4968_p3 = pnand %p4967_p13, %p4961_p1 }
 0x299   : > { %4971 = shalt.err (!%p4968_p3)
}
 0x29a   : > { %4770 = dma.vmem_to_hbm [thread:$0]  (%p5177_p12), %s6337_s13, 16, %s6335_s26, %s6341_s25   ;;  %v3332_v61 = vsub.f32 %v6193_v41, %v6339_v11  ;;  %v3333_v46 = vsub.f32 %v6185_v50, %v6339_v11  ;;  %v3334_v37 = vsub.f32 %v6190_v0, %v6339_v11  ;;  %v3335_v60 = vsub.f32 %v6205_v3, %v6339_v11 }
 0x29b   : > { %v3336_v18 = vsub.f32 %v6211_v63, %v6339_v11  ;;  %v3337_v44 = vsub.f32 %v6203_v30, %v6339_v11  ;;  %v3338_v9 = vsub.f32 %v6208_v43, %v6339_v11  ;;  %v3339_v41 = vsub.f32 %v6224_v36, %v6339_v11  ;;  %s246_s13 = scalar_lea.vmem [#allocation10], %s5225_s14  ;;  %s6467_s8 = scalar_lea.hbm %s6511_s4, %s3901_s28 }
 0x29c   : > { %v3340_v50 = vsub.f32 %v6229_v35, %v6339_v11  ;;  %v3341_v0 = vsub.f32 %v6221_v54, %v6339_v11  ;;  %v3342_v3 = vsub.f32 %v6226_v62, %v6339_v11  ;;  %v3343_v63 = vsub.f32 %v6241_v40, %v6339_v11  ;;  %s3509_s7 = sshll.u32 %s246_s13, 4  ;;  %s5058_s23 = smov [#allocation10]   ;;  %s3510_s7 = int_to_ptr.vmem [resolvable:$true] %s3509_s7 }
 0x29d   : > { %v3344_v30 = vsub.f32 %v6247_v23, %v6339_v11  ;;  %v3345_v43 = vsub.f32 %v6239_v57, %v6339_v11  ;;  %v3346_v36 = vsub.f32 %v6244_v34, %v6339_v11  ;;  %v6397_v35 = vsub.f32 %v6259_v14, %v6339_v11  ;;  %s4972_s21 = scalar_lea.vmem %s3510_s7, 16  ;;  %s4976_s10 = sshll.u32 %s5058_s23, 4  ;;  %s4977_s10 = int_to_ptr.vmem [resolvable:$false] %s4976_s10 }
 0x29e   : > { %v6401_v54 = vsub.f32 %v6265_v56, %v6339_v11  ;;  %v6405_v62 = vsub.f32 %v6257_v10, %v6339_v11  ;;  %v6409_v40 = vsub.f32 %v6262_v4, %v6339_v11  ;;  %v6413_v57 = vsub.f32 %v6277_v16, %v6339_v11  ;;  %p4973_p7 = scmp.ne.s32.totalorder %s3510_s7, %s4972_s21  ;;  %s4978_s14 = scalar_lea.vmem %s4977_s10, 32 }
 0x29f   : > { %v6417_v34 = vsub.f32 %v6285_v31, %v6339_v11  ;;  %v6421_v23 = vsub.f32 %v6275_v48, %v6339_v11  ;;  %v6425_v10 = vsub.f32 %v6282_v6, %v6339_v11  ;;  %v3323_v14 = vsub.f32 %v6150_v39, %v6339_v11  ;;  %p4979_p0 = scmp.lt.s32.totalorder %s3510_s7, %s4977_s10  ;;  %p4980_p5 = scmp.lt.s32.totalorder %s4978_s14, %s4972_s21 }
 0x2a0   : > { %v3324_v4 = vsub.f32 %v6154_v32, %v6339_v11  ;;  %v3325_v56 = vsub.f32 %v6147_v55, %v6339_v11  ;;  %v3326_v13 = vsub.f32 %v6152_v47, %v6339_v11  ;;  %v3327_v24 = vsub.f32 %v6169_v52, %v6339_v11  ;;  %p4974_p9 = pnand %p4973_p7, %p5177_p12 }
 0x2a1   : > { %v3388_v28 = vmul.f32 %v3323_v14, %v3323_v14  ;;  %v3328_v48 = vsub.f32 %v6175_v17, %v6339_v11  ;;  %v3329_v32 = vsub.f32 %v6167_v1, %v6339_v11  ;;  %v3330_v16 = vsub.f32 %v6172_v27, %v6339_v11  ;;  %p4981_p11 = por %p4980_p5, %p4979_p0 }
 0x2a2   : > { %v3389_v58 = vmul.f32 %v3324_v4, %v3324_v4  ;;  %v3390_v25 = vmul.f32 %v3325_v56, %v3325_v56  ;;  %v3391_v39 = vmul.f32 %v3326_v13, %v3326_v13  ;;  %v3392_v59 = vmul.f32 %v3327_v24, %v3327_v24  ;;  %p4975_p2 = pneg %p4974_p9 }
 0x2a3   : > { %v3393_v38 = vmul.f32 %v3328_v48, %v3328_v48  ;;  %v3331_v52 = vsub.f32 %v6187_v20, %v6339_v11  ;;  %v3394_v29 = vmul.f32 %v3329_v32, %v3329_v32  ;;  %v3395_v6 = vmul.f32 %v3330_v16, %v3330_v16 }
 0x2a4   : > { %v3420_v51 = vadd.f32 %v3389_v58, %v3388_v28  ;;  %v3397_v31 = vmul.f32 %v3332_v61, %v3332_v61  ;;  %v3398_v22 = vmul.f32 %v3333_v46, %v3333_v46  ;;  %v3399_v19 = vmul.f32 %v3334_v37, %v3334_v37  ;;  %p4982_p1 = pnand %p4981_p11, %p4975_p2 }
 0x2a5   : > { %v3396_v17 = vmul.f32 %v3331_v52, %v3331_v52  ;;  %v3400_v53 = vmul.f32 %v3335_v60, %v3335_v60  ;;  %v3401_v27 = vmul.f32 %v3336_v18, %v3336_v18  ;;  %v3402_v26 = vmul.f32 %v3337_v44, %v3337_v44 }
 0x2a6   : > { %v3421_v2 = vadd.f32 %v3420_v51, %v3390_v25  ;;  %v3403_v49 = vmul.f32 %v3338_v9, %v3338_v9  ;;  %v3404_v21 = vmul.f32 %v3339_v41, %v3339_v41  ;;  %v3405_v14 = vmul.f32 %v3340_v50, %v3340_v50 }
 0x2a7   : > { %v3406_v56 = vmul.f32 %v3341_v0, %v3341_v0  ;;  %v3407_v61 = vmul.f32 %v3342_v3, %v3342_v3  ;;  %v3408_v46 = vmul.f32 %v3343_v63, %v3343_v63  ;;  %v3409_v37 = vmul.f32 %v3344_v30, %v3344_v30 }
 0x2a8   : > { %v3422_v55 = vadd.f32 %v3421_v2, %v3391_v39  ;;  %v3410_v60 = vmul.f32 %v3345_v43, %v3345_v43  ;;  %v3411_v18 = vmul.f32 %v3346_v36, %v3346_v36  ;;  %v3412_v44 = vmul.f32 %v6397_v35, %v6397_v35 }
 0x2a9   : > { %v3413_v41 = vmul.f32 %v6401_v54, %v6401_v54  ;;  %v3414_v0 = vmul.f32 %v6405_v62, %v6405_v62  ;;  %v3415_v63 = vmul.f32 %v6409_v40, %v6409_v40  ;;  %v3416_v43 = vmul.f32 %v6413_v57, %v6413_v57 }
 0x2aa   : > { %v3423_v47 = vadd.f32 %v3422_v55, %v3392_v59  ;;  %v3417_v35 = vmul.f32 %v6417_v34, %v6417_v34  ;;  %v3418_v54 = vmul.f32 %v6421_v23, %v6421_v23  ;;  %v3419_v62 = vmul.f32 %v6425_v10, %v6425_v10 }
 0x2ac   : > { %v3424_v5 = vadd.f32 %v3423_v47, %v3393_v38 }
 0x2ae   : > { %v3425_v45 = vadd.f32 %v3424_v5, %v3394_v29 }
 0x2b0   : > { %v3426_v8 = vadd.f32 %v3425_v45, %v3395_v6 }
 0x2b2   : > { %v3427_v7 = vadd.f32 %v3426_v8, %v3396_v17 }
 0x2b4   : > { %v3428_v1 = vadd.f32 %v3427_v7, %v3397_v31 }
 0x2b6   : > { %v3429_v42 = vadd.f32 %v3428_v1, %v3398_v22 }
 0x2b8   : > { %v3430_v33 = vadd.f32 %v3429_v42, %v3399_v19 }
 0x2ba   : > { %v3431_v15 = vadd.f32 %v3430_v33, %v3400_v53 }
 0x2bc   : > { %v3432_v12 = vadd.f32 %v3431_v15, %v3401_v27 }
 0x2be   : > { %v3433_v20 = vadd.f32 %v3432_v12, %v3402_v26 }
 0x2c0   : > { %v3434_v11 = vadd.f32 %v3433_v20, %v3403_v49 }
 0x2c2   : > { %v3435_v4 = vadd.f32 %v3434_v11, %v3404_v21 }
 0x2c4   : > { %v3436_v28 = vadd.f32 %v3435_v4, %v3405_v14 }
 0x2c6   : > { %v3437_v58 = vadd.f32 %v3436_v28, %v3406_v56 }
 0x2c8   : > { %v3438_v13 = vadd.f32 %v3437_v58, %v3407_v61 }
 0x2ca   : > { %v3439_v24 = vadd.f32 %v3438_v13, %v3408_v46 }
 0x2cc   : > { %v3440_v25 = vadd.f32 %v3439_v24, %v3409_v37 }
 0x2ce   : > { %v3441_v51 = vadd.f32 %v3440_v25, %v3410_v60 }
 0x2d0   : > { %v3442_v9 = vadd.f32 %v3441_v51, %v3411_v18 }
 0x2d2   : > { %v3443_v50 = vadd.f32 %v3442_v9, %v3412_v44 }
 0x2d4   : > { %v3444_v3 = vadd.f32 %v3443_v50, %v3413_v41 }
 0x2d6   : > { %v3445_v30 = vadd.f32 %v3444_v3, %v3414_v0 }
 0x2d8   : > { %v3446_v36 = vadd.f32 %v3445_v30, %v3415_v63 }
 0x2da   : > { %v3447_v48 = vadd.f32 %v3446_v36, %v3416_v43 }
 0x2dc   : > { %v3448_v39 = vadd.f32 %v3447_v48, %v3417_v35 }
 0x2de   : > { %v3449_v2 = vadd.f32 %v3448_v39, %v3418_v54 }
 0x2e0   : > { %v3450_v40 = vadd.f32 %v3449_v2, %v3419_v62 }
 0x2e2   : > { %v3451_v32 = vrot.slane %v3450_v40, 4 }
 0x2e4   : > { %v3452_v59 = vadd.f32 %v3451_v32, %v3450_v40 }
 0x2e6   : > { %v3453_v55 = vrot.slane %v3452_v59, 2 }
 0x2e8   : > { %v3454_v57 = vadd.f32 %v3453_v55, %v3452_v59 }
 0x2ea   : > { %v3455_v16 = vrot.slane %v3454_v57, 1 }
 0x2ec   : > { %v3456_v34 = vadd.f32 %v3455_v16, %v3454_v57 }
 0x2ee   : > { %3457 = vst [vmem:[%s246_s13] sm:$0x1] %v3456_v34 }
 0x2ef   : > { %4985 = shalt.err (!%p4982_p1)
}
 0x2f0   : > { %s4986_s19 = scalar_lea.hbm %s6467_s8, 16  ;;  %s4990_s11 = scalar_lea.hbm %s6511_s4, 32 }
 0x2f1   : > { %p4987_p4 = scmp.ne.s32.totalorder %s6467_s8, %s4986_s19  ;;  %p4991_p10 = scmp.lt.u32.totalorder %s6467_s8, %s6511_s4 }
 0x2f2   : > { %p4992_p13 = scmp.lt.u32.totalorder %s4990_s11, %s4986_s19  ;;  %p4994_p7 = scmp.lt.u32.totalorder %s4986_s19, %s6467_s8 }
 0x2f3   : > { %p4988_p6 = pnand %p4987_p4, %p5177_p12 }
 0x2f4   : > { %p4993_p3 = por %p4992_p13, %p4991_p10 }
 0x2f5   : > { %p4989_p8 = pneg %p4988_p6 }
 0x2f6   : > { %p4995_p9 = por %p4994_p7, %p4993_p3 }
 0x2f8   : > { %p4996_p2 = pnand %p4995_p9, %p4989_p8 }
 0x2fa   : > { %4999 = shalt.err (!%p4996_p2)
}
 0x2fb   : > { %4771 = dma.vmem_to_hbm [thread:$0]  (%p5177_p12), %s3510_s7, 16, %s6467_s8, %s6341_s25  }
 0x2fc PF: > { %s3521_s24 = sand.u32 1, %s5034_s15   ;;  %p6600_p0 = scmp.ne.s32.totalorder %s6546_s22, 0 }
 0x2fd   : > { %p6601_p5 = scmp.ge.s32.totalorder %s5046_s18, 2  ;;  %s3522_s13 = scalar_lea.sflag [#allocation4], %s3521_s24 }
 0x2ff   : > { %p4784_p11 = pnand %p6601_p5, %p6600_p0 }
 0x301   : > { %5025 = dma.done.wait (!%p4784_p11), %s3522_s13, 2048  }
 0x302   : > { %5027 = vsyncadd (!%p4784_p11), %s3522_s13, 4294965248  ;;  %s3530_s26 = sand.u32 1, %s3642_s20  }
 0x303   : > { %s3531_s6 = scalar_lea.sflag [#allocation9], %s3530_s26 }
 0x304   : > { %5029 = dma.done.wait (!%p4784_p11), %s3531_s6, 32  }
 0x305   : > { %5031 = vsyncadd (!%p4784_p11), %s3531_s6, 4294967264  ;;  %p22_p12 = scmp.ge.s32.totalorder %s5142_s27, 4   ;;  %s6602_s15 = smov %s5038_s16 }
 0x306   : > { %s6603_s16 = smov %s5042_s17  ;;  %s6604_s17 = smov %s5173_s30 }
 0x307   : > { %s6605_s18 = smov %s5142_s27  ;;  %24 = sbr.rel (!%p22_p12) target bundleno = 8 (0x8), region = 117 }
 0x30e   :  { %3543 = vsyncpa [#allocation3], 1 }
 0x30f   :  { %3545 = vsyncpa [#allocation3 + $0x1], 1 }
 0x310   :  { %3546 = vsyncpa [#allocation6], 1 }
 0x311   :  { %3547 = vsyncpa [#allocation4], 1 }
 0x312   :  { %3549 = vsyncpa [#allocation4 + $0x1], 1 }
 0x313   :  { %3550 = vsyncpa [#allocation9], 1 }
 0x314   :  { %3552 = vsyncpa [#allocation9 + $0x1], 1 }

</bundles_post_ra>
